<compile_context>
chip_gen: v5e
topology: v5e:2x2
jax: 0.10.0
libtpu: 0.0.40
codegen_flags: <defaults>
</compile_context>

<pallas_src>
import functools

import jax
import jax.numpy as jnp
from jax.experimental import pallas as pl
from jax.experimental.pallas import tpu as pltpu


def _snnl_kernel(neg_scale_ref, xr_ref, xc_ref, sqr_ref, sqc_ref, yr_ref, yc_ref,
                 out_ref, m_sc, num_sc, den_sc, *, tb_j, resident_cols):
    i = pl.program_id(0)
    j = pl.program_id(1)
    tb_i = xr_ref.shape[0]

    # --- init online-logsumexp state at the first column tile ----------------
    @pl.when(j == 0)
    def _init():
        m_sc[...] = jnp.full_like(m_sc, -jnp.inf)
        num_sc[...] = jnp.zeros_like(num_sc)
        den_sc[...] = jnp.zeros_like(den_sc)

    col0 = j * tb_j
    c0 = pl.multiple_of(col0, tb_j)          # aligned start for lane/sublane slices

    xr = xr_ref[...]                                            # (tb_i, D) native dtype
    if resident_cols:
        xc = xc_ref[pl.ds(c0, tb_j), :]                         # slice resident operand
    else:
        xc = xc_ref[...]                                        # streamed column tile
    sq_j = sqc_ref[:, pl.ds(c0, tb_j)]                          # (1, tb_j) f32 (+inf on pads)
    y_j = yc_ref[:, pl.ds(c0, tb_j)]                            # (1, tb_j) int32 (-1 on pads)

    # Gram tile on the MXU, f32 accumulation.
    g = jax.lax.dot_general(xr, xc, (((1,), (1,)), ((), ())),
                            preferred_element_type=jnp.float32)  # (tb_i, tb_j)

    sq_i = sqr_ref[...]                                          # (tb_i, 1) f32 (precomputed)
    d2 = jnp.maximum((sq_i + sq_j) - 2.0 * g, 0.0)
    # std normalisation + 10**temp + negation folded into one scalar multiply.
    e = jnp.sqrt(d2) * neg_scale_ref[0]                          # (tb_i, tb_j)
    # pad columns: sq_j == +inf -> e == -inf -> exp underflows to exactly 0.

    same = yr_ref[...] == y_j                                    # (tb_i, tb_j) bool

    def _accumulate(e_blk):
        # online logsumexp with ONE shared exp for numerator & denominator
        blk_m = jnp.max(e_blk, axis=1, keepdims=True)
        m_new = jnp.maximum(m_sc[...], blk_m)
        safe_m = jnp.where(jnp.isfinite(m_new), m_new, 0.0)
        alpha = jnp.exp(m_sc[...] - safe_m)
        p = jnp.exp(e_blk - safe_m)                              # shared exp
        den_sc[...] = alpha * den_sc[...] + jnp.sum(p, axis=1, keepdims=True)
        num_sc[...] = alpha * num_sc[...] + jnp.sum(
            jnp.where(same, p, 0.0), axis=1, keepdims=True)
        m_sc[...] = m_new

    # Diagonal exclusion only on tiles that actually contain the diagonal.
    row0 = i * tb_i
    has_diag = jnp.logical_and(row0 < col0 + tb_j, col0 < row0 + tb_i)

    @pl.when(has_diag)
    def _diag_tile():
        r = jax.lax.broadcasted_iota(jnp.int32, (tb_i, tb_j), 0)
        c = jax.lax.broadcasted_iota(jnp.int32, (tb_i, tb_j), 1)
        _accumulate(jnp.where((r - c) == (col0 - row0), -jnp.inf, e))

    @pl.when(jnp.logical_not(has_diag))
    def _offdiag_tile():
        _accumulate(e)

    # --- finalize at the last column tile ------------------------------------
    @pl.when(j == pl.num_programs(1) - 1)
    def _finalize():
        ns = num_sc[...]
        ds = den_sc[...]
        # shared max cancels:  num - den = log(num_sum) - log(den_sum);
        # rows with no same-class neighbour (ns == 0) are zeroed like the ref.
        out_ref[...] = jnp.where(ns > 0.0, jnp.log(ns) - jnp.log(ds), 0.0)


def snn_loss(x, y, temp=None, std=True, eps=1e-6):
    """Pallas implementation of SNNLoss.forward(x, y, temp)."""
    del eps  # unused by the torch forward as well
    x = jnp.asarray(x)
    B, D = x.shape

    if temp is None:
        temp = 0.0
    temp = jnp.asarray(temp, dtype=jnp.float32).reshape(())
    scale = jnp.power(jnp.float32(10.0), temp)
    x32 = x.astype(jnp.float32)
    if std:
        # torch.Tensor.std(): unbiased (ddof=1) over ALL elements; folded into
        # the distance scale instead of rescaling x.
        scale = scale / jnp.std(x32, ddof=1)
    neg_scale = (-scale).reshape(1).astype(jnp.float32)

    # --- generation-aware knobs ----------------------------------------------
    try:
        kind = jax.devices()[0].device_kind.lower()
    except Exception:  # pragma: no cover
        kind = ""
    is_v5 = "v5" in kind
    if is_v5 or ("v6" in kind):
        vmem_limit = 96 * 1024 * 1024      # 128 MiB physical VMEM
    else:                                  # v7x: 64 MiB / TensorCore; unknown: stay safe
        vmem_limit = 48 * 1024 * 1024

    lane = 128
    bp = ((B + lane - 1) // lane) * lane
    tb_j = 256 if (bp % 256 == 0 and not is_v5) else 128   # MXU N width (v6e/v7x 2x256^2)
    tb_i = 256 if bp % 512 == 0 else 128                   # keep >= 2 row tiles for megacore
    pad = bp - B

    xk = x if x.dtype == jnp.bfloat16 else x32
    sq = jnp.sum(x32 * x32, axis=1)                        # precomputed row squared-norms
    y = jnp.asarray(y).astype(jnp.int32)
    if pad:
        xk = jnp.pad(xk, ((0, pad), (0, 0)))
        # +inf norm for pad columns -> e = -inf -> exp underflows to 0 (free masking)
        sq = jnp.pad(sq, (0, pad), constant_values=jnp.inf)
        # labels that can never match a real class
        y = jnp.pad(y, (0, pad), constant_values=-1)
    sq_col = sq.reshape(bp, 1)
    sq_row = sq.reshape(1, bp)
    y_col = y.reshape(bp, 1)
    y_row = y.reshape(1, bp)

    # Column operand residency: keep all of x in VMEM when it (double-buffered,
    # plus row tiles / intermediates) comfortably fits the per-core budget.
    xc_bytes = bp * D * xk.dtype.itemsize
    resident = xc_bytes <= vmem_limit // 4

    if resident:
        xc_spec = pl.BlockSpec((bp, D), lambda i, j: (0, 0))
    elif is_v5:
        # lowest HBM BW -> deeper buffering on the streamed column tiles
        xc_spec = pl.BlockSpec((tb_j, D), lambda i, j: (j, 0),
                               pipeline_mode=pl.Buffered(3))
    else:
        xc_spec = pl.BlockSpec((tb_j, D), lambda i, j: (j, 0))

    grid = (bp // tb_i, bp // tb_j)
    kernel = functools.partial(_snnl_kernel, tb_j=tb_j, resident_cols=resident)

    out = pl.pallas_call(
        kernel,
        out_shape=jax.ShapeDtypeStruct((bp, 1), jnp.float32),
        grid_spec=pltpu.PrefetchScalarGridSpec(
            num_scalar_prefetch=0,
            grid=grid,
            in_specs=[
                pl.BlockSpec(memory_space=pltpu.SMEM),             # -10**temp / std
                pl.BlockSpec((tb_i, D), lambda i, j: (i, 0)),      # x row tile
                xc_spec,                                           # x column operand
                pl.BlockSpec((tb_i, 1), lambda i, j: (i, 0)),      # row sq-norms
                pl.BlockSpec((1, bp), lambda i, j: (0, 0)),        # col sq-norms (resident)
                pl.BlockSpec((tb_i, 1), lambda i, j: (i, 0)),      # row labels
                pl.BlockSpec((1, bp), lambda i, j: (0, 0)),        # col labels (resident)
            ],
            out_specs=pl.BlockSpec((tb_i, 1), lambda i, j: (i, 0)),
            scratch_shapes=[pltpu.VMEM((tb_i, 1), jnp.float32)] * 3,
        ),
        compiler_params=pltpu.CompilerParams(
            dimension_semantics=("parallel", "arbitrary"),
            vmem_limit_bytes=vmem_limit,
        ),
    )(neg_scale, xk, xk, sq_col, sq_row, y_col, y_row)

    # per-row (num - den); pad rows sliced off, fixed-up rows already zeroed
    return -(jnp.sum(out[:B, 0]) / B)


def _snn_loss_ref(x, y, temp=0.0, std=True):
    """Pure-JAX reference mirroring the PyTorch forward exactly."""
    x = x.astype(jnp.float32)
    b = x.shape[0]
    if std:
        x = x / jnp.std(x, ddof=1)
    dist = jnp.sqrt(jnp.sum((x[:, None, :] - x[None, :, :]) ** 2, axis=-1))
    e = -dist * (10.0 ** temp)
    eye = jnp.eye(b, dtype=bool)
    den_dist = jnp.where(eye, -jnp.inf, e)
    same = y[:, None] == y[None, :]
    num_dist = jnp.where(same & ~eye, e, -jnp.inf)
    num = jax.scipy.special.logsumexp(num_dist, axis=1)
    den = jax.scipy.special.logsumexp(den_dist, axis=1)
    bad = jnp.isinf(num)
    num = jnp.where(bad, 0.0, num)
    den = jnp.where(bad, 0.0, den)
    return -jnp.mean(num - den)


if __name__ == "__main__":
    key = jax.random.PRNGKey(0)
    kx, ky = jax.random.split(key)
    B, D = 8, 32
    x = jax.random.normal(kx, (B, D), dtype=jnp.float32)
    y = jax.random.randint(ky, (B,), 0, 3, dtype=jnp.int32)

    # module defaults: temp=None -> 0.0, std=True
    loss = snn_loss(x, y)
    jax.block_until_ready(loss)
    ref = _snn_loss_ref(x, y)
    assert jnp.isfinite(loss), loss
    assert jnp.allclose(loss, ref, rtol=1e-3, atol=1e-4), (loss, ref)

    # exercise the "row with no same-class neighbour" fixup and a nonzero temp
    y2 = jnp.array([0, 1, 1, 2, 2, 2, 3, 0], dtype=jnp.int32).at[6].set(7)
    loss2 = snn_loss(x, y2, temp=0.3, std=False)
    jax.block_until_ready(loss2)
    ref2 = _snn_loss_ref(x, y2, temp=0.3, std=False)
    assert jnp.isfinite(loss2), loss2
    assert jnp.allclose(loss2, ref2, rtol=1e-3, atol=1e-4), (loss2, ref2)

    # exercise multi-tile grid, padding (non-multiple-of-128 batch) and the
    # gated diagonal / pad handling on a larger problem
    kx3, ky3 = jax.random.split(jax.random.PRNGKey(1))
    B3, D3 = 300, 64
    x3 = jax.random.normal(kx3, (B3, D3), dtype=jnp.float32)
    y3 = jax.random.randint(ky3, (B3,), 0, 5, dtype=jnp.int32)
    loss3 = snn_loss(x3, y3)
    jax.block_until_ready(loss3)
    ref3 = _snn_loss_ref(x3, y3)
    assert jnp.isfinite(loss3), loss3
    assert jnp.allclose(loss3, ref3, rtol=1e-3, atol=1e-4), (loss3, ref3)

    print("KERNEL_OK")
</pallas_src>

<mosaic_0001>
module attributes {stable_mosaic.version = 11 : i64} {
  func.func @_snnl_kernel(%arg0: i32, %arg1: i32, %arg2: memref<1xf32, #tpu.memory_space<smem>>, %arg3: memref<128x32xf32, #tpu.memory_space<vmem>>, %arg4: memref<128x32xf32, #tpu.memory_space<vmem>>, %arg5: memref<128x1xf32, #tpu.memory_space<vmem>>, %arg6: memref<1x128xf32, #tpu.memory_space<vmem>>, %arg7: memref<128x1xi32, #tpu.memory_space<vmem>>, %arg8: memref<1x128xi32, #tpu.memory_space<vmem>>, %arg9: memref<128x1xf32, #tpu.memory_space<vmem>>, %arg10: memref<128x1xf32, #tpu.memory_space<vmem>>, %arg11: memref<128x1xf32, #tpu.memory_space<vmem>>, %arg12: memref<128x1xf32, #tpu.memory_space<vmem>>) attributes {dimension_semantics = [#tpu.dimension_semantics<parallel>, #tpu.dimension_semantics<arbitrary>], iteration_bounds = array<i64: 1, 1>, scalar_prefetch = 0 : i64, scratch_operands = 3 : i64, tpu.core_type = #tpu.core_type<tc>, window_params = [{transform_indices = @transform_0, window_bounds = array<i64: 1>}, {transform_indices = @transform_1, window_bounds = array<i64: 128, 32>}, {pipeline_mode = #tpu.pipeline_mode<synchronous>, transform_indices = @transform_2, window_bounds = array<i64: 128, 32>}, {transform_indices = @transform_3, window_bounds = array<i64: 128, 1>}, {pipeline_mode = #tpu.pipeline_mode<synchronous>, transform_indices = @transform_4, window_bounds = array<i64: 1, 128>}, {transform_indices = @transform_5, window_bounds = array<i64: 128, 1>}, {pipeline_mode = #tpu.pipeline_mode<synchronous>, transform_indices = @transform_6, window_bounds = array<i64: 1, 128>}, {transform_indices = @transform_7, window_bounds = array<i64: 128, 1>}]} {
    %c0_i32 = arith.constant 0 : i32
    %0 = arith.cmpi eq, %arg1, %c0_i32 : i32
    %1 = arith.extui %0 : i1 to i32
    %c0_i32_0 = arith.constant 0 : i32
    %2 = arith.cmpi ne, %1, %c0_i32_0 : i32
    scf.if %2 {
      %cst_19 = arith.constant 0xFF800000 : f32
      %44 = vector.broadcast %cst_19 : f32 to vector<128x1xf32>
      %c0_20 = arith.constant 0 : index
      %c0_21 = arith.constant 0 : index
      %45 = vector.load %arg10[%c0_20, %c0_21] : memref<128x1xf32, #tpu.memory_space<vmem>>, vector<128x1xf32>
      tpu.vector_store %arg10[%c0_20, %c0_21], %44 {strides = array<i32>} : memref<128x1xf32, #tpu.memory_space<vmem>>, vector<128x1xf32>,
      %cst_22 = arith.constant 0.000000e+00 : f32
      %46 = vector.broadcast %cst_22 : f32 to vector<128x1xf32>
      %c0_23 = arith.constant 0 : index
      %c0_24 = arith.constant 0 : index
      %47 = vector.load %arg11[%c0_23, %c0_24] : memref<128x1xf32, #tpu.memory_space<vmem>>, vector<128x1xf32>
      tpu.vector_store %arg11[%c0_23, %c0_24], %46 {strides = array<i32>} : memref<128x1xf32, #tpu.memory_space<vmem>>, vector<128x1xf32>,
      %cst_25 = arith.constant 0.000000e+00 : f32
      %48 = vector.broadcast %cst_25 : f32 to vector<128x1xf32>
      %c0_26 = arith.constant 0 : index
      %c0_27 = arith.constant 0 : index
      %49 = vector.load %arg12[%c0_26, %c0_27] : memref<128x1xf32, #tpu.memory_space<vmem>>, vector<128x1xf32>
      tpu.vector_store %arg12[%c0_26, %c0_27], %48 {strides = array<i32>} : memref<128x1xf32, #tpu.memory_space<vmem>>, vector<128x1xf32>,
    } else {
    }
    %c128_i32 = arith.constant 128 : i32
    %3 = arith.muli %arg1, %c128_i32 : i32
    %4 = tpu.assume_multiple %3, 128 : i32
    %c0 = arith.constant 0 : index
    %c0_1 = arith.constant 0 : index
    %5 = vector.load %arg3[%c0, %c0_1] : memref<128x32xf32, #tpu.memory_space<vmem>>, vector<128x32xf32>
    %6 = arith.index_cast %4 : i32 to index
    %c0_2 = arith.constant 0 : index
    %7 = vector.load %arg4[%6, %c0_2] : memref<128x32xf32, #tpu.memory_space<vmem>>, vector<128x32xf32>
    %c0_3 = arith.constant 0 : index
    %8 = arith.index_cast %4 : i32 to index
    %9 = vector.load %arg6[%c0_3, %8] : memref<1x128xf32, #tpu.memory_space<vmem>>, vector<1x128xf32>
    %c0_4 = arith.constant 0 : index
    %10 = arith.index_cast %4 : i32 to index
    %11 = vector.load %arg8[%c0_4, %10] : memref<1x128xi32, #tpu.memory_space<vmem>>, vector<1x128xi32>
    %cst = arith.constant dense<0.000000e+00> : vector<128x128xf32>
    %12 = tpu.matmul %5, %7, %cst {dimension_numbers = #tpu.dot_dimension_numbers<[1], [1], [0], [0], [0, 0, 1, 0], [], []>} : vector<128x32xf32>, vector<128x32xf32>, vector<128x128xf32> -> vector<128x128xf32>
    %c0_5 = arith.constant 0 : index
    %c0_6 = arith.constant 0 : index
    %13 = vector.load %arg5[%c0_5, %c0_6] : memref<128x1xf32, #tpu.memory_space<vmem>>, vector<128x1xf32>
    %14 = vector.broadcast %13 : vector<128x1xf32> to vector<128x128xf32>
    %15 = vector.broadcast %9 : vector<1x128xf32> to vector<128x128xf32>
    %16 = arith.addf %14, %15 : vector<128x128xf32>
    %cst_7 = arith.constant 2.000000e+00 : f32
    %17 = vector.broadcast %cst_7 : f32 to vector<128x128xf32>
    %18 = arith.mulf %17, %12 : vector<128x128xf32>
    %19 = arith.subf %16, %18 : vector<128x128xf32>
    %cst_8 = arith.constant 0.000000e+00 : f32
    %20 = vector.broadcast %cst_8 : f32 to vector<128x128xf32>
    %21 = arith.maximumf %19, %20 : vector<128x128xf32>
    %22 = math.sqrt %21 : vector<128x128xf32>
    %c0_9 = arith.constant 0 : index
    %23 = memref.load %arg2[%c0_9] : memref<1xf32, #tpu.memory_space<smem>>
    %24 = vector.broadcast %23 : f32 to vector<128x128xf32>
    %25 = arith.mulf %22, %24 : vector<128x128xf32>
    %c0_10 = arith.constant 0 : index
    %c0_11 = arith.constant 0 : index
    %26 = vector.load %arg7[%c0_10, %c0_11] : memref<128x1xi32, #tpu.memory_space<vmem>>, vector<128x1xi32>
    %27 = vector.broadcast %26 : vector<128x1xi32> to vector<128x128xi32>
    %28 = vector.broadcast %11 : vector<1x128xi32> to vector<128x128xi32>
    %29 = arith.cmpi eq, %27, %28 : vector<128x128xi32>
    %c128_i32_12 = arith.constant 128 : i32
    %30 = arith.muli %arg0, %c128_i32_12 : i32
    %c128_i32_13 = arith.constant 128 : i32
    %31 = arith.addi %3, %c128_i32_13 : i32
    %32 = arith.cmpi slt, %30, %31 : i32
    %c128_i32_14 = arith.constant 128 : i32
    %33 = arith.addi %30, %c128_i32_14 : i32
    %34 = arith.cmpi slt, %3, %33 : i32
    %35 = arith.andi %32, %34 : i1
    %36 = arith.extui %35 : i1 to i32
    %c0_i32_15 = arith.constant 0 : i32
    %37 = arith.cmpi ne, %36, %c0_i32_15 : i32
    scf.if %37 {
      %44 = tpu.iota {dimensions = array<i32: 0>} : vector<128x128xi32>
      %45 = tpu.iota {dimensions = array<i32: 1>} : vector<128x128xi32>
      %46 = arith.subi %44, %45 : vector<128x128xi32>
      %47 = arith.subi %3, %30 : i32
      %48 = vector.broadcast %47 : i32 to vector<128x128xi32>
      %49 = arith.cmpi eq, %46, %48 : vector<128x128xi32>
      %cst_19 = arith.constant 0xFF800000 : f32
      %50 = vector.broadcast %cst_19 : f32 to vector<128x128xf32>
      %51 = arith.select %49, %50, %25 : vector<128x128xi1>, vector<128x128xf32>
      %cst_20 = arith.constant dense<0xFF800000> : vector<128xf32>
      %52 = vector.multi_reduction <maximumf>, %51, %cst_20 [1] : vector<128x128xf32> to vector<128xf32>
      %53 = vector.shape_cast %52 : vector<128xf32> to vector<128x1xf32>
      %c0_21 = arith.constant 0 : index
      %c0_22 = arith.constant 0 : index
      %54 = vector.load %arg10[%c0_21, %c0_22] : memref<128x1xf32, #tpu.memory_space<vmem>>, vector<128x1xf32>
      %55 = arith.maximumf %54, %53 : vector<128x1xf32>
      %56 = tpu.weird %55 : vector<128x1xf32> -> vector<128x1xi1>
      %cst_23 = arith.constant dense<true> : vector<128x1xi1>
      %57 = arith.xori %56, %cst_23 : vector<128x1xi1>
      %cst_24 = arith.constant 0.000000e+00 : f32
      %58 = vector.broadcast %cst_24 : f32 to vector<128x1xf32>
      %59 = arith.select %57, %55, %58 : vector<128x1xi1>, vector<128x1xf32>
      %c0_25 = arith.constant 0 : index
      %c0_26 = arith.constant 0 : index
      %60 = vector.load %arg10[%c0_25, %c0_26] : memref<128x1xf32, #tpu.memory_space<vmem>>, vector<128x1xf32>
      %61 = arith.subf %60, %59 : vector<128x1xf32>
      %62 = math.exp %61 : vector<128x1xf32>
      %63 = vector.broadcast %59 : vector<128x1xf32> to vector<128x128xf32>
      %64 = arith.subf %51, %63 : vector<128x128xf32>
      %65 = math.exp %64 : vector<128x128xf32>
      %c0_27 = arith.constant 0 : index
      %c0_28 = arith.constant 0 : index
      %66 = vector.load %arg12[%c0_27, %c0_28] : memref<128x1xf32, #tpu.memory_space<vmem>>, vector<128x1xf32>
      %67 = arith.mulf %62, %66 : vector<128x1xf32>
      %cst_29 = arith.constant dense<0.000000e+00> : vector<128xf32>
      %68 = vector.multi_reduction <add>, %65, %cst_29 [1] : vector<128x128xf32> to vector<128xf32>
      %69 = vector.shape_cast %68 : vector<128xf32> to vector<128x1xf32>
      %70 = arith.addf %67, %69 : vector<128x1xf32>
      %c0_30 = arith.constant 0 : index
      %c0_31 = arith.constant 0 : index
      %71 = vector.load %arg12[%c0_30, %c0_31] : memref<128x1xf32, #tpu.memory_space<vmem>>, vector<128x1xf32>
      tpu.vector_store %arg12[%c0_30, %c0_31], %70 {strides = array<i32>} : memref<128x1xf32, #tpu.memory_space<vmem>>, vector<128x1xf32>,
      %c0_32 = arith.constant 0 : index
      %c0_33 = arith.constant 0 : index
      %72 = vector.load %arg11[%c0_32, %c0_33] : memref<128x1xf32, #tpu.memory_space<vmem>>, vector<128x1xf32>
      %73 = arith.mulf %62, %72 : vector<128x1xf32>
      %cst_34 = arith.constant 0.000000e+00 : f32
      %74 = vector.broadcast %cst_34 : f32 to vector<128x128xf32>
      %75 = arith.select %29, %65, %74 : vector<128x128xi1>, vector<128x128xf32>
      %cst_35 = arith.constant dense<0.000000e+00> : vector<128xf32>
      %76 = vector.multi_reduction <add>, %75, %cst_35 [1] : vector<128x128xf32> to vector<128xf32>
      %77 = vector.shape_cast %76 : vector<128xf32> to vector<128x1xf32>
      %78 = arith.addf %73, %77 : vector<128x1xf32>
      %c0_36 = arith.constant 0 : index
      %c0_37 = arith.constant 0 : index
      %79 = vector.load %arg11[%c0_36, %c0_37] : memref<128x1xf32, #tpu.memory_space<vmem>>, vector<128x1xf32>
      tpu.vector_store %arg11[%c0_36, %c0_37], %78 {strides = array<i32>} : memref<128x1xf32, #tpu.memory_space<vmem>>, vector<128x1xf32>,
      %c0_38 = arith.constant 0 : index
      %c0_39 = arith.constant 0 : index
      %80 = vector.load %arg10[%c0_38, %c0_39] : memref<128x1xf32, #tpu.memory_space<vmem>>, vector<128x1xf32>
      tpu.vector_store %arg10[%c0_38, %c0_39], %55 {strides = array<i32>} : memref<128x1xf32, #tpu.memory_space<vmem>>, vector<128x1xf32>,
    } else {
    }
    %true = arith.constant true
    %38 = arith.xori %35, %true : i1
    %39 = arith.extui %38 : i1 to i32
    %c0_i32_16 = arith.constant 0 : i32
    %40 = arith.cmpi ne, %39, %c0_i32_16 : i32
    scf.if %40 {
      %cst_19 = arith.constant dense<0xFF800000> : vector<128xf32>
      %44 = vector.multi_reduction <maximumf>, %25, %cst_19 [1] : vector<128x128xf32> to vector<128xf32>
      %45 = vector.shape_cast %44 : vector<128xf32> to vector<128x1xf32>
      %c0_20 = arith.constant 0 : index
      %c0_21 = arith.constant 0 : index
      %46 = vector.load %arg10[%c0_20, %c0_21] : memref<128x1xf32, #tpu.memory_space<vmem>>, vector<128x1xf32>
      %47 = arith.maximumf %46, %45 : vector<128x1xf32>
      %48 = tpu.weird %47 : vector<128x1xf32> -> vector<128x1xi1>
      %cst_22 = arith.constant dense<true> : vector<128x1xi1>
      %49 = arith.xori %48, %cst_22 : vector<128x1xi1>
      %cst_23 = arith.constant 0.000000e+00 : f32
      %50 = vector.broadcast %cst_23 : f32 to vector<128x1xf32>
      %51 = arith.select %49, %47, %50 : vector<128x1xi1>, vector<128x1xf32>
      %c0_24 = arith.constant 0 : index
      %c0_25 = arith.constant 0 : index
      %52 = vector.load %arg10[%c0_24, %c0_25] : memref<128x1xf32, #tpu.memory_space<vmem>>, vector<128x1xf32>
      %53 = arith.subf %52, %51 : vector<128x1xf32>
      %54 = math.exp %53 : vector<128x1xf32>
      %55 = vector.broadcast %51 : vector<128x1xf32> to vector<128x128xf32>
      %56 = arith.subf %25, %55 : vector<128x128xf32>
      %57 = math.exp %56 : vector<128x128xf32>
      %c0_26 = arith.constant 0 : index
      %c0_27 = arith.constant 0 : index
      %58 = vector.load %arg12[%c0_26, %c0_27] : memref<128x1xf32, #tpu.memory_space<vmem>>, vector<128x1xf32>
      %59 = arith.mulf %54, %58 : vector<128x1xf32>
      %cst_28 = arith.constant dense<0.000000e+00> : vector<128xf32>
      %60 = vector.multi_reduction <add>, %57, %cst_28 [1] : vector<128x128xf32> to vector<128xf32>
      %61 = vector.shape_cast %60 : vector<128xf32> to vector<128x1xf32>
      %62 = arith.addf %59, %61 : vector<128x1xf32>
      %c0_29 = arith.constant 0 : index
      %c0_30 = arith.constant 0 : index
      %63 = vector.load %arg12[%c0_29, %c0_30] : memref<128x1xf32, #tpu.memory_space<vmem>>, vector<128x1xf32>
      tpu.vector_store %arg12[%c0_29, %c0_30], %62 {strides = array<i32>} : memref<128x1xf32, #tpu.memory_space<vmem>>, vector<128x1xf32>,
      %c0_31 = arith.constant 0 : index
      %c0_32 = arith.constant 0 : index
      %64 = vector.load %arg11[%c0_31, %c0_32] : memref<128x1xf32, #tpu.memory_space<vmem>>, vector<128x1xf32>
      %65 = arith.mulf %54, %64 : vector<128x1xf32>
      %cst_33 = arith.constant 0.000000e+00 : f32
      %66 = vector.broadcast %cst_33 : f32 to vector<128x128xf32>
      %67 = arith.select %29, %57, %66 : vector<128x128xi1>, vector<128x128xf32>
      %cst_34 = arith.constant dense<0.000000e+00> : vector<128xf32>
      %68 = vector.multi_reduction <add>, %67, %cst_34 [1] : vector<128x128xf32> to vector<128xf32>
      %69 = vector.shape_cast %68 : vector<128xf32> to vector<128x1xf32>
      %70 = arith.addf %65, %69 : vector<128x1xf32>
      %c0_35 = arith.constant 0 : index
      %c0_36 = arith.constant 0 : index
      %71 = vector.load %arg11[%c0_35, %c0_36] : memref<128x1xf32, #tpu.memory_space<vmem>>, vector<128x1xf32>
      tpu.vector_store %arg11[%c0_35, %c0_36], %70 {strides = array<i32>} : memref<128x1xf32, #tpu.memory_space<vmem>>, vector<128x1xf32>,
      %c0_37 = arith.constant 0 : index
      %c0_38 = arith.constant 0 : index
      %72 = vector.load %arg10[%c0_37, %c0_38] : memref<128x1xf32, #tpu.memory_space<vmem>>, vector<128x1xf32>
      tpu.vector_store %arg10[%c0_37, %c0_38], %47 {strides = array<i32>} : memref<128x1xf32, #tpu.memory_space<vmem>>, vector<128x1xf32>,
    } else {
    }
    %c0_i32_17 = arith.constant 0 : i32
    %41 = arith.cmpi eq, %arg1, %c0_i32_17 : i32
    %42 = arith.extui %41 : i1 to i32
    %c0_i32_18 = arith.constant 0 : i32
    %43 = arith.cmpi ne, %42, %c0_i32_18 : i32
    scf.if %43 {
      %c0_19 = arith.constant 0 : index
      %c0_20 = arith.constant 0 : index
      %44 = vector.load %arg11[%c0_19, %c0_20] : memref<128x1xf32, #tpu.memory_space<vmem>>, vector<128x1xf32>
      %c0_21 = arith.constant 0 : index
      %c0_22 = arith.constant 0 : index
      %45 = vector.load %arg12[%c0_21, %c0_22] : memref<128x1xf32, #tpu.memory_space<vmem>>, vector<128x1xf32>
      %cst_23 = arith.constant 0.000000e+00 : f32
      %46 = vector.broadcast %cst_23 : f32 to vector<128x1xf32>
      %47 = arith.cmpf ogt, %44, %46 : vector<128x1xf32>
      %48 = math.log %44 : vector<128x1xf32>
      %49 = math.log %45 : vector<128x1xf32>
      %50 = arith.subf %48, %49 : vector<128x1xf32>
      %cst_24 = arith.constant 0.000000e+00 : f32
      %51 = vector.broadcast %cst_24 : f32 to vector<128x1xf32>
      %52 = arith.select %47, %50, %51 : vector<128x1xi1>, vector<128x1xf32>
      %c0_25 = arith.constant 0 : index
      %c0_26 = arith.constant 0 : index
      %53 = vector.load %arg9[%c0_25, %c0_26] : memref<128x1xf32, #tpu.memory_space<vmem>>, vector<128x1xf32>
      tpu.vector_store %arg9[%c0_25, %c0_26], %52 {strides = array<i32>} : memref<128x1xf32, #tpu.memory_space<vmem>>, vector<128x1xf32>,
    } else {
    }
    return
  }
  func.func @transform_0(%arg0: i32, %arg1: i32) -> i32 {
    %c0_i32 = arith.constant 0 : i32
    %c0_i32_0 = arith.constant 0 : i32
    return %c0_i32 : i32
  }
  func.func @transform_1(%arg0: i32, %arg1: i32) -> (i32, i32) {
    %c0_i32 = arith.constant 0 : i32
    %c0_i32_0 = arith.constant 0 : i32
    return %arg0, %c0_i32 : i32, i32
  }
  func.func @transform_2(%arg0: i32, %arg1: i32) -> (i32, i32) {
    %c0_i32 = arith.constant 0 : i32
    %c0_i32_0 = arith.constant 0 : i32
    %c0_i32_1 = arith.constant 0 : i32
    return %c0_i32, %c0_i32_0 : i32, i32
  }
  func.func @transform_3(%arg0: i32, %arg1: i32) -> (i32, i32) {
    %c0_i32 = arith.constant 0 : i32
    %c0_i32_0 = arith.constant 0 : i32
    return %arg0, %c0_i32 : i32, i32
  }
  func.func @transform_4(%arg0: i32, %arg1: i32) -> (i32, i32) {
    %c0_i32 = arith.constant 0 : i32
    %c0_i32_0 = arith.constant 0 : i32
    %c0_i32_1 = arith.constant 0 : i32
    return %c0_i32, %c0_i32_0 : i32, i32
  }
  func.func @transform_5(%arg0: i32, %arg1: i32) -> (i32, i32) {
    %c0_i32 = arith.constant 0 : i32
    %c0_i32_0 = arith.constant 0 : i32
    return %arg0, %c0_i32 : i32, i32
  }
  func.func @transform_6(%arg0: i32, %arg1: i32) -> (i32, i32) {
    %c0_i32 = arith.constant 0 : i32
    %c0_i32_0 = arith.constant 0 : i32
    %c0_i32_1 = arith.constant 0 : i32
    return %c0_i32, %c0_i32_0 : i32, i32
  }
  func.func @transform_7(%arg0: i32, %arg1: i32) -> (i32, i32) {
    %c0_i32 = arith.constant 0 : i32
    %c0_i32_0 = arith.constant 0 : i32
    return %arg0, %c0_i32 : i32, i32
  }
}

</mosaic_0001>

<bundles_post_ra>
// kernel: tpu_custom_call.1
= control target key start
LH: loop header
LB: loop body
LE: loop exit
PB: predicated region body
PF: predicated region fallthrough
CT: control target
= control target key end

     0   :  { %vm120_vm0 = vcmask 261120   ;;  %v2263_v0 = vmov 0   ;;  %s3535_s3 = inlined_call_operand.vmem [shape: f32[128,1], index: 3, kind: input, shape index: {}]   ;;  %s3536_s2 = inlined_call_operand.vmem [shape: f32[128,32], index: 2, kind: input, shape index: {}]   ;;  %s3537_s4 = inlined_call_operand.vmem [shape: f32[1,128], index: 4, kind: input, shape index: {}]   ;;  %s3538_s6 = inlined_call_operand.vmem [shape: s32[1,128], index: 6, kind: input, shape index: {}]   ;;  %s3539_s5 = inlined_call_operand.vmem [shape: s32[128,1], index: 5, kind: input, shape index: {}]   ;;  %s3540_s1 = inlined_call_operand.vmem [shape: f32[128,32], index: 1, kind: input, shape index: {}]   ;;  %s3541_s0 = inlined_call_operand.<no memory space> [shape: f32[1], index: 0, kind: input, shape index: {}]   ;;  %s3542_s7 = inlined_call_operand.vmem [shape: f32[128,1], index: 7, kind: output, shape index: {}]  }
   0x1   :  { %2097 = vset.pattern.permute.xlu0 %v2263_v0  ;;  %2098 = vset.pattern.permute.xlu1 %v2263_v0  ;;  %v282_v1 = vld [vmem:[%s3535_s3] sm:$0xff]  ;;  %v113_v2 = vld [vmem:[%s3536_s2 + $0x78] sm:$0xff]  ;;  %v284_v3 = vld [vmem:[%s3535_s3 + $0x10] sm:$0xff] }
   0x2   :  { %300 = vperm.xlu0 %2097, %v282_v1   ;;  %2013 = vmatpush.xpose.msk.msra.mxu0 %vm120_vm0, %v113_v2  ;;  %v112_v4 = vld [vmem:[%s3536_s2 + $0x70] sm:$0xff]  ;;  %v286_v5 = vld [vmem:[%s3535_s3 + $0x20] sm:$0xff]  ;;  %v283_v6 = vld [vmem:[%s3535_s3 + $0x8] sm:$0xff] }
   0x3   :  { %2045 = vmatpush.xpose.msk.msra.mxu1 %vm120_vm0, %v113_v2  ;;  %2046 = vmatpush.xpose.msk.msra.mxu2 %vm120_vm0, %v113_v2  ;;  %v111_v7 = vld [vmem:[%s3536_s2 + $0x68] sm:$0xff]  ;;  %v285_v8 = vld [vmem:[%s3535_s3 + $0x18] sm:$0xff]  ;;  %v110_v9 = vld [vmem:[%s3536_s2 + $0x60] sm:$0xff] }
   0x4   :  { %2047 = vmatpush.xpose.msk.msra.mxu3 %vm120_vm0, %v113_v2  ;;  %310 = vperm.xlu1 %2098, %v284_v3   ;;  %v287_v10 = vld [vmem:[%s3535_s3 + $0x28] sm:$0xff]  ;;  %v288_v11 = vld [vmem:[%s3535_s3 + $0x30] sm:$0xff]  ;;  %v109_v12 = vld [vmem:[%s3536_s2 + $0x58] sm:$0xff] }
   0x5   :  { %2099 = vset.pattern.permute.xlu2 %v2263_v0  ;;  %v289_v13 = vld [vmem:[%s3535_s3 + $0x38] sm:$0xff]  ;;  %v108_v14 = vld [vmem:[%s3536_s2 + $0x50] sm:$0xff]  ;;  %v290_v15 = vld [vmem:[%s3535_s3 + $0x40] sm:$0xff] }
   0x6   :  { %2014 = vmatpush.xpose.msk.msra.mxu0 %vm120_vm0, %v112_v4  ;;  %320 = vperm.xlu2 %2099, %v286_v5   ;;  %v291_v16 = vld [vmem:[%s3535_s3 + $0x48] sm:$0xff]  ;;  %v292_v18 = vld [vmem:[%s3535_s3 + $0x50] sm:$0xff]  ;;  %v106_v19 = vld [vmem:[%s3536_s2 + $0x40] sm:$0xff] }
   0x7   :  { %2048 = vmatpush.xpose.msk.msra.mxu1 %vm120_vm0, %v112_v4  ;;  %2049 = vmatpush.xpose.msk.msra.mxu2 %vm120_vm0, %v112_v4  ;;  %v107_v17 = vld [vmem:[%s3536_s2 + $0x48] sm:$0xff]  ;;  %v293_v20 = vld [vmem:[%s3535_s3 + $0x58] sm:$0xff]  ;;  %v294_v21 = vld [vmem:[%s3535_s3 + $0x60] sm:$0xff] }
   0x8   :  { %2050 = vmatpush.xpose.msk.msra.mxu3 %vm120_vm0, %v112_v4  ;;  %v105_v22 = vld [vmem:[%s3536_s2 + $0x38] sm:$0xff]  ;;  %v295_v23 = vld [vmem:[%s3535_s3 + $0x68] sm:$0xff]  ;;  %v104_v24 = vld [vmem:[%s3536_s2 + $0x30] sm:$0xff] }
   0x9   :  { %v296_v25 = vld [vmem:[%s3535_s3 + $0x70] sm:$0xff]  ;;  %v297_v26 = vld [vmem:[%s3535_s3 + $0x78] sm:$0xff]  ;;  %v103_v27 = vld [vmem:[%s3536_s2 + $0x28] sm:$0xff] }
   0xa   :  { %305 = vperm.xlu0 %2097, %v283_v6   ;;  %2015 = vmatpush.xpose.msk.msra.mxu0 %vm120_vm0, %v111_v7  ;;  %v655_v28 = vld [vmem:[%s3539_s5] sm:$0xff]  ;;  %v656_v30 = vld [vmem:[%s3539_s5 + $0x8] sm:$0xff]  ;;  %v657_v31 = vld [vmem:[%s3539_s5 + $0x10] sm:$0xff] }
   0xb   :  { %2051 = vmatpush.xpose.msk.msra.mxu1 %vm120_vm0, %v111_v7  ;;  %2052 = vmatpush.xpose.msk.msra.mxu2 %vm120_vm0, %v111_v7  ;;  %v102_v29 = vld [vmem:[%s3536_s2 + $0x20] sm:$0xff]  ;;  %v101_v32 = vld [vmem:[%s3536_s2 + $0x18] sm:$0xff]  ;;  %v100_v34 = vld [vmem:[%s3536_s2 + $0x10] sm:$0xff] }
   0xc   :  { %2053 = vmatpush.xpose.msk.msra.mxu3 %vm120_vm0, %v111_v7  ;;  %315 = vperm.xlu1 %2098, %v285_v8   ;;  %v658_v33 = vld [vmem:[%s3539_s5 + $0x18] sm:$0xff]  ;;  %v659_v35 = vld [vmem:[%s3539_s5 + $0x20] sm:$0xff]  ;;  %v660_v36 = vld [vmem:[%s3539_s5 + $0x28] sm:$0xff] }
   0xd   :  { %v99_v37 = vld [vmem:[%s3536_s2 + $0x8] sm:$0xff]  ;;  %v661_v38 = vld [vmem:[%s3539_s5 + $0x30] sm:$0xff]  ;;  %v98_v39 = vld [vmem:[%s3536_s2] sm:$0xff] }
   0xe   :  { %2016 = vmatpush.xpose.msk.msra.mxu0 %vm120_vm0, %v110_v9  ;;  %325 = vperm.xlu2 %2099, %v287_v10   ;;  %v662_v40 = vld [vmem:[%s3539_s5 + $0x38] sm:$0xff]  ;;  %v81_v41 = vld [vmem:[%s3540_s1] sm:$0xff]  ;;  %v664_v46 = vld [vmem:[%s3539_s5 + $0x48] sm:$0xff] }
   0xf   :  { %2054 = vmatpush.xpose.msk.msra.mxu1 %vm120_vm0, %v110_v9  ;;  %2055 = vmatpush.xpose.msk.msra.mxu2 %vm120_vm0, %v110_v9  ;;  %v85_v42 = vld [vmem:[%s3540_s1 + $0x20] sm:$0xff]  ;;  %v665_v47 = vld [vmem:[%s3539_s5 + $0x50] sm:$0xff]  ;;  %v82_v48 = vld [vmem:[%s3540_s1 + $0x8] sm:$0xff] }
  0x10   :  { %2056 = vmatpush.xpose.msk.msra.mxu3 %vm120_vm0, %v110_v9  ;;  %v89_v43 = vld [vmem:[%s3540_s1 + $0x40] sm:$0xff]  ;;  %v86_v49 = vld [vmem:[%s3540_s1 + $0x28] sm:$0xff]  ;;  %v666_v52 = vld [vmem:[%s3539_s5 + $0x58] sm:$0xff] }
  0x11   :  { %v93_v44 = vld [vmem:[%s3540_s1 + $0x60] sm:$0xff]  ;;  %v90_v50 = vld [vmem:[%s3540_s1 + $0x48] sm:$0xff]  ;;  %v83_v55 = vld [vmem:[%s3540_s1 + $0x10] sm:$0xff] }
  0x12   :  { %330 = vperm.xlu0 %2097, %v288_v11   ;;  %2017 = vmatpush.xpose.msk.msra.mxu0 %vm120_vm0, %v109_v12  ;;  %v663_v45 = vld [vmem:[%s3539_s5 + $0x40] sm:$0xff]  ;;  %v94_v51 = vld [vmem:[%s3540_s1 + $0x68] sm:$0xff]  ;;  %v87_v56 = vld [vmem:[%s3540_s1 + $0x30] sm:$0xff] }
  0x13   :  { %2057 = vmatpush.xpose.msk.msra.mxu1 %vm120_vm0, %v109_v12  ;;  %2058 = vmatpush.xpose.msk.msra.mxu2 %vm120_vm0, %v109_v12  ;;  %v667_v53 = vld [vmem:[%s3539_s5 + $0x60] sm:$0xff]  ;;  %v668_v54 = vld [vmem:[%s3539_s5 + $0x68] sm:$0xff]  ;;  %v91_v57 = vld [vmem:[%s3540_s1 + $0x50] sm:$0xff] }
  0x14   :  { %2059 = vmatpush.xpose.msk.msra.mxu3 %vm120_vm0, %v109_v12  ;;  %335 = vperm.xlu1 %2098, %v289_v13   ;;  %v95_v58 = vld [vmem:[%s3540_s1 + $0x70] sm:$0xff]  ;;  %v670_v60 = vld [vmem:[%s3539_s5 + $0x78] sm:$0xff] }
  0x15   :  { %v669_v59 = vld [vmem:[%s3539_s5 + $0x70] sm:$0xff]  ;;  %v84_v61 = vld [vmem:[%s3540_s1 + $0x18] sm:$0xff] }
  0x16   :  { %2018 = vmatpush.xpose.msk.msra.mxu0 %vm120_vm0, %v108_v14  ;;  %340 = vperm.xlu2 %2099, %v290_v15   ;;  %v88_v62 = vld [vmem:[%s3540_s1 + $0x38] sm:$0xff] }
  0x17   :  { %2060 = vmatpush.xpose.msk.msra.mxu1 %vm120_vm0, %v108_v14  ;;  %2061 = vmatpush.xpose.msk.msra.mxu2 %vm120_vm0, %v108_v14  ;;  %v92_v63 = vld [vmem:[%s3540_s1 + $0x58] sm:$0xff] }
  0x18   :  { %2062 = vmatpush.xpose.msk.msra.mxu3 %vm120_vm0, %v108_v14  ;;  %v96_v0 = vld [vmem:[%s3540_s1 + $0x78] sm:$0xff] }
  0x1a   :  { %345 = vperm.xlu0 %2097, %v291_v16   ;;  %2019 = vmatpush.xpose.msk.msra.mxu0 %vm120_vm0, %v107_v17 }
  0x1b   :  { %2063 = vmatpush.xpose.msk.msra.mxu1 %vm120_vm0, %v107_v17  ;;  %2064 = vmatpush.xpose.msk.msra.mxu2 %vm120_vm0, %v107_v17 }
  0x1c   :  { %2065 = vmatpush.xpose.msk.msra.mxu3 %vm120_vm0, %v107_v17  ;;  %350 = vperm.xlu1 %2098, %v292_v18   ;;  %v2590_v18 = vld [vmem:[%s3538_s6] ss:$0 sm:$0xff] }
  0x1e   :  { %2020 = vmatpush.xpose.msk.msra.mxu0 %vm120_vm0, %v106_v19  ;;  %355 = vperm.xlu2 %2099, %v293_v20  }
  0x1f   :  { %2066 = vmatpush.xpose.msk.msra.mxu1 %vm120_vm0, %v106_v19  ;;  %2067 = vmatpush.xpose.msk.msra.mxu2 %vm120_vm0, %v106_v19 }
  0x20   :  { %2068 = vmatpush.xpose.msk.msra.mxu3 %vm120_vm0, %v106_v19 }
  0x22   :  { %360 = vperm.xlu0 %2097, %v294_v21   ;;  %2021 = vmatpush.xpose.msk.msra.mxu0 %vm120_vm0, %v105_v22 }
  0x23   :  { %2069 = vmatpush.xpose.msk.msra.mxu1 %vm120_vm0, %v105_v22  ;;  %2070 = vmatpush.xpose.msk.msra.mxu2 %vm120_vm0, %v105_v22 }
  0x24   :  { %2071 = vmatpush.xpose.msk.msra.mxu3 %vm120_vm0, %v105_v22  ;;  %365 = vperm.xlu1 %2098, %v295_v23  }
  0x26   :  { %2022 = vmatpush.xpose.msk.msra.mxu0 %vm120_vm0, %v104_v24  ;;  %370 = vperm.xlu2 %2099, %v296_v25  }
  0x27   :  { %2072 = vmatpush.xpose.msk.msra.mxu1 %vm120_vm0, %v104_v24  ;;  %2073 = vmatpush.xpose.msk.msra.mxu2 %vm120_vm0, %v104_v24 }
  0x28   :  { %2074 = vmatpush.xpose.msk.msra.mxu3 %vm120_vm0, %v104_v24 }
  0x2a   :  { %375 = vperm.xlu0 %2097, %v297_v26   ;;  %2023 = vmatpush.xpose.msk.msra.mxu0 %vm120_vm0, %v103_v27 }
  0x2b   :  { %2075 = vmatpush.xpose.msk.msra.mxu1 %vm120_vm0, %v103_v27  ;;  %2076 = vmatpush.xpose.msk.msra.mxu2 %vm120_vm0, %v103_v27 }
  0x2c   :  { %2077 = vmatpush.xpose.msk.msra.mxu3 %vm120_vm0, %v103_v27  ;;  %672 = vperm.xlu1 %2098, %v655_v28   ;;  %v2100_v27 = vld [vmem:[%s3537_s4] ss:$0 sm:$0xff] }
  0x2e   :  { %2024 = vmatpush.xpose.msk.msra.mxu0 %vm120_vm0, %v102_v29  ;;  %675 = vperm.xlu2 %2099, %v656_v30  }
  0x2f   :  { %2078 = vmatpush.xpose.msk.msra.mxu1 %vm120_vm0, %v102_v29  ;;  %2079 = vmatpush.xpose.msk.msra.mxu2 %vm120_vm0, %v102_v29 }
  0x30   :  { %2080 = vmatpush.xpose.msk.msra.mxu3 %vm120_vm0, %v102_v29 }
  0x32   :  { %678 = vperm.xlu0 %2097, %v657_v31   ;;  %2025 = vmatpush.xpose.msk.msra.mxu0 %vm120_vm0, %v101_v32 }
  0x33   :  { %2081 = vmatpush.xpose.msk.msra.mxu1 %vm120_vm0, %v101_v32  ;;  %2082 = vmatpush.xpose.msk.msra.mxu2 %vm120_vm0, %v101_v32 }
  0x34   :  { %2083 = vmatpush.xpose.msk.msra.mxu3 %vm120_vm0, %v101_v32  ;;  %681 = vperm.xlu1 %2098, %v658_v33  }
  0x36   :  { %2026 = vmatpush.xpose.msk.msra.mxu0 %vm120_vm0, %v100_v34  ;;  %684 = vperm.xlu2 %2099, %v659_v35  }
  0x37   :  { %2084 = vmatpush.xpose.msk.msra.mxu1 %vm120_vm0, %v100_v34  ;;  %2085 = vmatpush.xpose.msk.msra.mxu2 %vm120_vm0, %v100_v34 }
  0x38   :  { %2086 = vmatpush.xpose.msk.msra.mxu3 %vm120_vm0, %v100_v34 }
  0x3a   :  { %687 = vperm.xlu0 %2097, %v660_v36   ;;  %2027 = vmatpush.xpose.msk.msra.mxu0 %vm120_vm0, %v99_v37 }
  0x3b   :  { %2087 = vmatpush.xpose.msk.msra.mxu1 %vm120_vm0, %v99_v37  ;;  %2088 = vmatpush.xpose.msk.msra.mxu2 %vm120_vm0, %v99_v37 }
  0x3c   :  { %2089 = vmatpush.xpose.msk.msra.mxu3 %vm120_vm0, %v99_v37  ;;  %690 = vperm.xlu1 %2098, %v661_v38  }
  0x3e   :  { %2028 = vmatpush.xpose.msk.msra.mxu0 %vm120_vm0, %v98_v39  ;;  %693 = vperm.xlu2 %2099, %v662_v40  }
  0x3f   :  { %2090 = vmatpush.xpose.msk.msra.mxu1 %vm120_vm0, %v98_v39  ;;  %2091 = vmatpush.xpose.msk.msra.mxu2 %vm120_vm0, %v98_v39 }
  0x40   :  { %2092 = vmatpush.xpose.msk.msra.mxu3 %vm120_vm0, %v98_v39 }
  0x41   :  { %2029 = vmatmul.msk.f32.vlgmr.msra.gmra.mxu0 %vm120_vm0, %v81_v41  ;;  %v745_v41 = vlaneseq }
  0x42   :  { %2033 = vmatmul.msk.f32.vlgmr.msra.gmra.mxu1 %vm120_vm0, %v85_v42  ;;  %2037 = vmatmul.msk.f32.vlgmr.msra.gmra.mxu2 %vm120_vm0, %v89_v43 }
  0x43   :  { %2041 = vmatmul.msk.f32.vlgmr.msra.gmra.mxu3 %vm120_vm0, %v93_v44  ;;  %696 = vperm.xlu0 %2097, %v663_v45  }
  0x44   :  { %699 = vperm.xlu1 %2098, %v664_v46  }
  0x46   :  { %702 = vperm.xlu2 %2099, %v665_v47  }
  0x49   :  { %2030 = vmatmul.msk.f32.gmra.mxu0 %vm120_vm0, %v82_v48 }
  0x4a   :  { %2034 = vmatmul.msk.f32.gmra.mxu1 %vm120_vm0, %v86_v49  ;;  %2038 = vmatmul.msk.f32.gmra.mxu2 %vm120_vm0, %v90_v50 }
  0x4b   :  { %2042 = vmatmul.msk.f32.gmra.mxu3 %vm120_vm0, %v94_v51  ;;  %705 = vperm.xlu0 %2097, %v666_v52  }
  0x4c   :  { %708 = vperm.xlu1 %2098, %v667_v53  }
  0x4e   :  { %711 = vperm.xlu2 %2099, %v668_v54  }
  0x51   :  { %2031 = vmatmul.msk.f32.gmra.mxu0 %vm120_vm0, %v83_v55 }
  0x52   :  { %2035 = vmatmul.msk.f32.gmra.mxu1 %vm120_vm0, %v87_v56  ;;  %2039 = vmatmul.msk.f32.gmra.mxu2 %vm120_vm0, %v91_v57 }
  0x53   :  { %2043 = vmatmul.msk.f32.gmra.mxu3 %vm120_vm0, %v95_v58  ;;  %714 = vperm.xlu0 %2097, %v669_v59   ;;  %v2637_v58 = vshrl.u32 %v745_v41, 7  ;;  %v2639_v59 = vand.u32 127, %v745_v41 }
  0x54   :  { %717 = vperm.xlu1 %2098, %v670_v60  }
  0x59   :  { %2032 = vmatmul.msk.f32.gmra.mxu0 %vm120_vm0, %v84_v61 }
  0x5a   :  { %2036 = vmatmul.msk.f32.gmra.mxu1 %vm120_vm0, %v88_v62  ;;  %2040 = vmatmul.msk.f32.gmra.mxu2 %vm120_vm0, %v92_v63 }
  0x5b   :  { %2044 = vmatmul.msk.f32.gmra.mxu3 %vm120_vm0, %v96_v0 }
  0x60   :  { %v321_v1 = vpop.permute.xlu2 %320 }
  0x61   :  { %v385_v33 = vadd.f32 %v2100_v27, %v321_v1 }
  0x68   :  { %v326_v2 = vpop.permute.xlu2 %325 }
  0x69   :  { %v386_v39 = vadd.f32 %v2100_v27, %v326_v2 }
  0x70   :  { %v341_v3 = vpop.permute.xlu2 %340 }
  0x71   :  { %v389_v43 = vadd.f32 %v2100_v27, %v341_v3  ;;  %v2650_v3 = vadd.s32 96, %v2637_v58 }
  0x74   :  { %v301_v4 = vpop.permute.xlu0 %300 }
  0x75   :  { %v381_v30 = vadd.f32 %v2100_v27, %v301_v4  ;;  %v2653_v4 = vadd.s32 64, %v2637_v58 }
  0x76   :  { %v311_v5 = vpop.permute.xlu1 %310 }
  0x77   :  { %v2628_v42 = vadd.f32 %v2100_v27, %v311_v5 }
  0x78   :  { %v356_v6 = vpop.permute.xlu2 %355 }
  0x79   :  { %v2630_v44 = vadd.f32 %v2100_v27, %v356_v6 }
  0x7c   :  { %v306_v7 = vpop.permute.xlu0 %305 }
  0x7d   :  { %v382_v47 = vadd.f32 %v2100_v27, %v306_v7 }
  0x7e   :  { %v316_v8 = vpop.permute.xlu1 %315 }
  0x7f   :  { %v2632_v48 = vadd.f32 %v2100_v27, %v316_v8 }
  0x80   :  { %v371_v9 = vpop.permute.xlu2 %370 }
  0x81   :  { %v2635_v56 = vadd.f32 %v2100_v27, %v371_v9 }
  0x84   :  { %v331_v10 = vpop.permute.xlu0 %330 }
  0x85   :  { %v2641_v60 = vadd.f32 %v2100_v27, %v331_v10  ;;  %v764_v10 = vsub.s32 %v2637_v58, %v2639_v59 }
  0x86   :  { %v336_v11 = vpop.permute.xlu1 %335 }
  0x87   :  { %v2643_v61 = vadd.f32 %v2100_v27, %v336_v11  ;;  %v2665_v11 = vadd.s32 32, %v2637_v58  ;;  %vm2687_vm8 = vcmp.eq.s32.totalorder %v764_v10, 0 }
  0x88   :  { %v2579_v12 = vpop.permute.xlu2 %675 }
  0x8c   :  { %v346_v13 = vpop.permute.xlu0 %345 }
  0x8d   :  { %v390_v62 = vadd.f32 %v2100_v27, %v346_v13 }
  0x8e   :  { %v2581_v14 = vpop.permute.xlu1 %350 }
  0x8f   :  { %v2656_v5 = vadd.f32 %v2100_v27, %v2581_v14 }
  0x90   :  { %v2583_v15 = vpop.permute.xlu2 %684 }
  0x94   :  { %v361_v16 = vpop.permute.xlu0 %360 }
  0x95   :  { %v393_v49 = vadd.f32 %v2100_v27, %v361_v16 }
  0x96   :  { %v2585_v17 = vpop.permute.xlu1 %365 }
  0x97   :  { %v394_v8 = vadd.f32 %v2100_v27, %v2585_v17  ;;  %v2675_v17 = vstv %s3541_s0 }
  0x98   :  { %v2592_v19 = vpop.permute.xlu2 %693 }
  0x99   :  { %vm727_vm1 = vcmp.eq.s32.totalorder %v2592_v19, %v2590_v18 }
  0x9c   :  { %v2596_v20 = vpop.permute.xlu0 %375 }
  0x9d   :  { %v2670_v14 = vadd.f32 %v2100_v27, %v2596_v20  ;;  %v772_v20 = vsub.s32 %v2653_v4, %v2639_v59 }
  0x9e   :  { %v2598_v21 = vpop.permute.xlu1 %672 }
  0x9f   :  { %vm2720_vm12 = vcmp.eq.s32.totalorder %v772_v20, 0 }
  0xa0   :  { %v2600_v22 = vpop.permute.xlu2 %702 }
  0xa1   :  { %vm730_vm2 = vcmp.eq.s32.totalorder %v2600_v22, %v2590_v18 }
  0xa4   :  { %v2604_v23 = vpop.permute.xlu0 %678 }
  0xa5   :  { %vm722_vm3 = vcmp.eq.s32.totalorder %v2604_v23, %v2590_v18 }
  0xa6   :  { %v2608_v24 = vpop.permute.xlu1 %681 }
  0xa7   :  { %vm723_vm4 = vcmp.eq.s32.totalorder %v2608_v24, %v2590_v18 }
  0xac   :  { %v2612_v25 = vpop.permute.xlu0 %687 }
  0xb5   :  { %v2614_v26 = vpop.permute.xlu0 %696 }
  0xbd   :  { %v2619_v28 = vpop.permute.xlu0 %705 }
  0xbe   :  { %vm731_vm5 = vcmp.eq.s32.totalorder %v2619_v28, %v2590_v18  ;;  %v234_v29 = vpop.f32.mrf.mxu0 }
  0xbf   :  { %v397_v31 = vmul.f32 2.0, %v234_v29  ;;  %v246_v32 = vpop.f32.mrf.mxu1 }
  0xc0   :  { %v401_v34 = vmul.f32 2.0, %v246_v32 }
  0xc1   :  { %v413_v35 = vsub.f32 %v381_v30, %v397_v31 }
  0xc2   :  { %v417_v36 = vsub.f32 %v385_v33, %v401_v34 }
  0xc3   :  { %v2623_v37 = vmax.f32 %v413_v35, 0.0  ;;  %v776_v35 = vsub.s32 %v2650_v3, %v2639_v59 }
  0xc4   :  { %v2625_v38 = vmax.f32 %v417_v36, 0.0 }
  0xc5   :  { %2102 = vrsqrt.f32 %v2623_v37  ;;  %v258_v40 = vpop.f32.mrf.mxu2  ;;  %vm452_vm6 = vcmp.eq.f32.partialorder %v2623_v37, inf  ;;  %vm454_vm7 = vcmp.eq.f32.partialorder %v2623_v37, 0.0  ;;  %vm2739_vm15 = vcmp.eq.s32.totalorder %v776_v35, 0 }
  0xc6   :  { %v405_v45 = vmul.f32 2.0, %v258_v40  ;;  %v270_v46 = vpop.f32.mrf.mxu3  ;;  %v237_v51 = vpop.f32.mrf.mxu0  ;;  %2104 = vrsqrt.f32 %v2625_v38  ;;  %vm500_vm14 = vcmp.eq.f32.partialorder %v2625_v38, inf  ;;  %vm502_vm0 = vcmp.eq.f32.partialorder %v2625_v38, 0.0 }
  0xc7   :  { %v409_v50 = vmul.f32 2.0, %v270_v46  ;;  %v249_v52 = vpop.f32.mrf.mxu1  ;;  %v398_v54 = vmul.f32 2.0, %v237_v51  ;;  %v455_v51 = vand.u32 2147483648, %v2623_v37 }
  0xc8   :  { %v421_v53 = vsub.f32 %v389_v43, %v405_v45  ;;  %v402_v55 = vmul.f32 2.0, %v249_v52  ;;  %v768_v45 = vsub.s32 %v2665_v11, %v2639_v59 }
  0xc9   :  { %v425_v57 = vsub.f32 %v393_v49, %v409_v50  ;;  %v414_v2 = vsub.f32 %v382_v47, %v398_v54 }
  0xca   :  { %v2645_v63 = vmax.f32 %v421_v53, 0.0  ;;  %v418_v6 = vsub.f32 %v386_v39, %v402_v55 }
  0xcb   :  { %v2103_v0 = vpop.eup %2102  ;;  %v2647_v1 = vmax.f32 %v425_v57, 0.0  ;;  %v2677_v31 = vmax.f32 %v414_v2, 0.0  ;;  %v503_v2 = vand.u32 2147483648, %v2625_v38 }
  0xcc   :  { %2106 = vrsqrt.f32 %v2645_v63  ;;  %v446_v7 = vmul.f32 %v2103_v0, %v2623_v37  ;;  %v2667_v13 = vpop.eup %2104  ;;  %v2683_v27 = vmax.f32 %v418_v6, 0.0  ;;  %vm548_vm9 = vcmp.eq.f32.partialorder %v2645_v63, inf }
  0xcd   :  { %2108 = vrsqrt.f32 %v2647_v1  ;;  %v261_v9 = vpop.f32.mrf.mxu2  ;;  %v494_v43 = vmul.f32 %v2667_v13, %v2625_v38  ;;  %v599_v6 = vand.u32 2147483648, %v2647_v1  ;;  %vm550_vm10 = vcmp.eq.f32.partialorder %v2645_v63, 0.0 }
  0xce   :  { %v406_v16 = vmul.f32 2.0, %v261_v9  ;;  %v273_v29 = vpop.f32.mrf.mxu3  ;;  %v447_v30 = vmul.f32 %v2103_v0, %v446_v7  ;;  %v240_v33 = vpop.f32.mrf.mxu0  ;;  %2110 = vrsqrt.f32 %v2677_v31  ;;  %vm596_vm11 = vcmp.eq.f32.partialorder %v2647_v1, inf }
  0xcf   :  { %v410_v32 = vmul.f32 2.0, %v273_v29  ;;  %v252_v34 = vpop.f32.mrf.mxu1  ;;  %v399_v39 = vmul.f32 2.0, %v240_v33  ;;  %v495_v55 = vmul.f32 %v2667_v13, %v494_v43  ;;  %2112 = vrsqrt.f32 %v2683_v27 }
  0xd0   :  { %v422_v36 = vsub.f32 %v390_v62, %v406_v16  ;;  %v448_v40 = vmul.f32 0.5, %v447_v30  ;;  %v403_v49 = vmul.f32 2.0, %v252_v34  ;;  %vm598_vm13 = vcmp.eq.f32.partialorder %v2647_v1, 0.0 }
  0xd1   :  { %v426_v53 = vsub.f32 %v394_v8, %v410_v32  ;;  %v415_v57 = vsub.f32 %v2628_v42, %v399_v39  ;;  %v551_v42 = vand.u32 2147483648, %v2645_v63  ;;  %v496_v33 = vmul.f32 0.5, %v495_v55 }
  0xd2   :  { %v2107_v46 = vpop.eup %2106  ;;  %v2695_v47 = vmax.f32 %v422_v36, 0.0  ;;  %v449_v50 = vsub.f32 1.5, %v448_v40  ;;  %v419_v8 = vsub.f32 %v2641_v60, %v403_v49  ;;  %v2725_v40 = vadd.s32 72, %v2637_v58 }
  0xd3   :  { %v2109_v52 = vpop.eup %2108  ;;  %v542_v54 = vmul.f32 %v2107_v46, %v2645_v63  ;;  %v2714_v34 = vmax.f32 %v415_v57, 0.0 }
  0xd4   :  { %v450_v62 = vmul.f32 %v2103_v0, %v449_v50  ;;  %2114 = vrsqrt.f32 %v2695_v47  ;;  %v590_v4 = vmul.f32 %v2109_v52, %v2647_v1  ;;  %v2711_v0 = vmax.f32 %v426_v53, 0.0  ;;  %v2727_v43 = vpop.eup %2110 }
  0xd5   :  { %v264_v3 = vpop.f32.mrf.mxu2  ;;  %v543_v7 = vmul.f32 %v2107_v46, %v542_v54  ;;  %v2733_v55 = vpop.eup %2112  ;;  %v2735_v20 = vmax.f32 %v419_v8, 0.0 }
  0xd6   :  { %v407_v9 = vmul.f32 2.0, %v264_v3  ;;  %v276_v10 = vpop.f32.mrf.mxu3  ;;  %v451_v11 = vmul.f32 %v450_v62, %v2623_v37  ;;  %v243_v16 = vpop.f32.mrf.mxu0  ;;  %v591_v30 = vmul.f32 %v2109_v52, %v590_v4  ;;  %2116 = vrsqrt.f32 %v2711_v0 }
  0xd7   :  { %v255_v29 = vpop.f32.mrf.mxu1  ;;  %v544_v32 = vmul.f32 0.5, %v543_v7  ;;  %v411_v60 = vmul.f32 2.0, %v276_v10  ;;  %v400_v49 = vmul.f32 2.0, %v243_v16  ;;  %v497_v10 = vsub.f32 1.5, %v496_v33 }
  0xd8   :  { %v453_v36 = vsel %vm452_vm6, %v2623_v37, %v451_v11  ;;  %v592_v53 = vmul.f32 0.5, %v591_v30  ;;  %v423_v57 = vsub.f32 %v2656_v5, %v407_v9  ;;  %v404_v62 = vmul.f32 2.0, %v255_v29 }
  0xd9   :  { %v456_v50 = vsel %vm454_vm7, %v455_v51, %v453_v36  ;;  %v545_v54 = vsub.f32 1.5, %v544_v32  ;;  %vm2745_vm6 = vcmp.eq.s32.totalorder %v768_v45, 0  ;;  %2118 = vrsqrt.f32 %v2714_v34 }
  0xda   :  { %v639_v3 = vmul.f32 %v2675_v17, %v456_v50  ;;  %v2115_v37 = vpop.eup %2114  ;;  %v593_v51 = vsub.f32 1.5, %v592_v53  ;;  %v427_v5 = vsub.f32 %v2635_v56, %v411_v60  ;;  %v773_v9 = vsub.s32 %v2725_v40, %v2639_v59 }
  0xdb   :  { %v546_v7 = vmul.f32 %v2107_v46, %v545_v54  ;;  %v416_v11 = vsub.f32 %v2632_v48, %v400_v49  ;;  %v498_v29 = vmul.f32 %v2667_v13, %v497_v10  ;;  %2120 = vrsqrt.f32 %v2735_v20 }
  0xdc   :  { %v2753_v35 = vsel %vm2687_vm8, -inf, %v639_v3  ;;  %v594_v45 = vmul.f32 %v2109_v52, %v593_v51  ;;  %v2762_v56 = vmax.f32 %v423_v57, 0.0  ;;  %v420_v41 = vsub.f32 %v2643_v61, %v404_v62  ;;  %v2775_v61 = vpop.eup %2116 }
  0xdd   :  { %v267_v16 = vpop.f32.mrf.mxu2  ;;  %814 = vmax.xlane.f32.xlu2 %v2753_v35  ;;  %v547_v46 = vmul.f32 %v546_v7, %v2645_v63  ;;  %v554_v32 = vmul.f32 %v2115_v37, %v2695_v47  ;;  %v2770_v36 = vmax.f32 %v427_v5, 0.0  ;;  %v499_v40 = vmul.f32 %v498_v29, %v2625_v38 }
  0xde   :  { %v279_v30 = vpop.f32.mrf.mxu3  ;;  %v408_v33 = vmul.f32 2.0, %v267_v16  ;;  %v595_v48 = vmul.f32 %v594_v45, %v2647_v1  ;;  %v2777_v50 = vmax.f32 %v416_v11, 0.0  ;;  %vm560_vm7 = vcmp.eq.f32.partialorder %v2695_v47, inf }
  0xdf   :  { %v412_v60 = vmul.f32 2.0, %v279_v30  ;;  %v549_v52 = vsel %vm548_vm9, %v2645_v63, %v547_v46  ;;  %v555_v49 = vmul.f32 %v2115_v37, %v554_v32  ;;  %v2785_v62 = vpop.eup %2118  ;;  %2122 = vrsqrt.f32 %v2762_v56 }
  0xe0   :  { %v552_v13 = vsel %vm550_vm10, %v551_v42, %v549_v52  ;;  %v597_v54 = vsel %vm596_vm11, %v2647_v1, %v595_v48  ;;  %v424_v3 = vsub.f32 %v2630_v44, %v408_v33  ;;  %2124 = vrsqrt.f32 %v2770_v36 }
  0xe1   :  { %v428_v53 = vsub.f32 %v2670_v14, %v412_v60  ;;  %v647_v57 = vmul.f32 %v2675_v17, %v552_v13  ;;  %v600_v63 = vsel %vm598_vm13, %v599_v6, %v597_v54  ;;  %v501_v14 = vsel %vm500_vm14, %v2625_v38, %v499_v40  ;;  %v2805_v1 = vpop.eup %2120 }
  0xe2   :  { %v556_v42 = vmul.f32 0.5, %v555_v49  ;;  %v651_v51 = vmul.f32 %v2675_v17, %v600_v63  ;;  %v504_v10 = vsel %vm502_vm0, %v503_v2, %v501_v14  ;;  %2126 = vrsqrt.f32 %v2777_v50 }
  0xe3   :  { %v2799_v7 = vsel %vm2720_vm12, -inf, %v647_v57  ;;  %v2808_v6 = vmax.f32 %v428_v53, 0.0  ;;  %v643_v44 = vmul.f32 %v2675_v17, %v504_v10  ;;  %v2813_v39 = vmax.f32 %v420_v41, 0.0 }
  0xe4   :  { %830 = vmax.xlane.f32.xlu0 %v2799_v7  ;;  %v557_v5 = vsub.f32 1.5, %v556_v42  ;;  %v2817_v11 = vsel %vm2739_vm15, -inf, %v651_v51  ;;  %v458_v38 = vmul.f32 %v2727_v43, %v2677_v31  ;;  %vm562_vm8 = vcmp.eq.f32.partialorder %v2695_v47, 0.0 }
  0xe5   :  { %838 = vmax.xlane.f32.xlu1 %v2817_v11  ;;  %v2824_v2 = vsel %vm2745_vm6, -inf, %v643_v44  ;;  %v747_v45 = vadd.s32 8, %v2637_v58  ;;  %v2828_v46 = vmax.f32 %v424_v3, 0.0  ;;  %v563_v4 = vand.u32 2147483648, %v2695_v47  ;;  %v2835_v30 = vpop.eup %2122 }
  0xe6   :  { %v558_v16 = vmul.f32 %v2115_v37, %v557_v5  ;;  %822 = vmax.xlane.f32.xlu2 %v2824_v2  ;;  %v459_v29 = vmul.f32 %v2727_v43, %v458_v38  ;;  %v602_v41 = vmul.f32 %v2775_v61, %v2711_v0  ;;  %2128 = vrsqrt.f32 %v2808_v6  ;;  %v2849_v52 = vpop.eup %2124 }
  0xe7   :  { %vm2839_vm9 = vcmp.eq.s32.totalorder %v773_v9, 0  ;;  %vm464_vm10 = vcmp.eq.f32.partialorder %v2677_v31, inf  ;;  %v759_v32 = vadd.s32 104, %v2637_v58  ;;  %vm466_vm11 = vcmp.eq.f32.partialorder %v2677_v31, 0.0 }
  0xe8   :  { %v559_v37 = vmul.f32 %v558_v16, %v2695_v47  ;;  %v460_v33 = vmul.f32 0.5, %v459_v29  ;;  %v603_v60 = vmul.f32 %v2775_v61, %v602_v41  ;;  %v470_v48 = vmul.f32 %v2785_v62, %v2714_v34  ;;  %v2857_v49 = vpop.eup %2126 }
  0xe9   :  { %v467_v13 = vand.u32 2147483648, %v2677_v31  ;;  %v765_v40 = vsub.s32 %v747_v45, %v2639_v59  ;;  %vm608_vm12 = vcmp.eq.f32.partialorder %v2711_v0, inf  ;;  %vm610_vm13 = vcmp.eq.f32.partialorder %v2711_v0, 0.0 }
  0xea   :  { %v561_v9 = vsel %vm560_vm7, %v2695_v47, %v559_v37  ;;  %v461_v54 = vsub.f32 1.5, %v460_v33  ;;  %v604_v57 = vmul.f32 0.5, %v603_v60  ;;  %v471_v63 = vmul.f32 %v2785_v62, %v470_v48 }
  0xeb   :  { %v564_v53 = vsel %vm562_vm8, %v563_v4, %v561_v9  ;;  %v777_v42 = vsub.s32 %v759_v32, %v2639_v59  ;;  %v748_v3 = vadd.s32 16, %v2637_v58  ;;  %v506_v47 = vmul.f32 %v2733_v55, %v2683_v27 }
  0xec   :  { %v648_v14 = vmul.f32 %v2675_v17, %v564_v53  ;;  %v462_v51 = vmul.f32 %v2727_v43, %v461_v54  ;;  %v605_v10 = vsub.f32 1.5, %v604_v57  ;;  %v472_v44 = vmul.f32 0.5, %v471_v63  ;;  %v2869_v5 = vpop.eup %2128 }
  0xed   :  { %vm2875_vm14 = vcmp.eq.s32.totalorder %v765_v40, 0  ;;  %v611_v45 = vand.u32 2147483648, %v2711_v0  ;;  %vm476_vm15 = vcmp.eq.f32.partialorder %v2714_v34, inf  ;;  %v507_v41 = vmul.f32 %v2733_v55, %v506_v47 }
  0xee   :  { %v2873_v38 = vsel %vm2839_vm9, -inf, %v648_v14  ;;  %v463_v43 = vmul.f32 %v462_v51, %v2677_v31  ;;  %v606_v4 = vmul.f32 %v2775_v61, %v605_v10  ;;  %v473_v29 = vsub.f32 1.5, %v472_v44 }
  0xef   :  { %832 = vmax.xlane.f32.xlu1 %v2873_v38  ;;  %vm2885_vm0 = vcmp.eq.s32.totalorder %v777_v42, 0  ;;  %vm478_vm6 = vcmp.eq.f32.partialorder %v2714_v34, 0.0  ;;  %v766_v8 = vsub.s32 %v748_v3, %v2639_v59  ;;  %v566_v32 = vmul.f32 %v2835_v30, %v2762_v56 }
  0xf0   :  { %v465_v33 = vsel %vm464_vm10, %v2677_v31, %v463_v43  ;;  %v607_v61 = vmul.f32 %v606_v4, %v2711_v0  ;;  %v474_v60 = vmul.f32 %v2785_v62, %v473_v29  ;;  %v508_v48 = vmul.f32 0.5, %v507_v41 }
  0xf1   :  { %v468_v9 = vsel %vm466_vm11, %v467_v13, %v465_v33  ;;  %v479_v40 = vand.u32 2147483648, %v2714_v34  ;;  %v751_v53 = vadd.s32 40, %v2637_v58  ;;  %v567_v54 = vmul.f32 %v2835_v30, %v566_v32 }
  0xf2   :  { %v640_v57 = vmul.f32 %v2675_v17, %v468_v9  ;;  %v609_v63 = vsel %vm608_vm12, %v2711_v0, %v607_v61  ;;  %v475_v14 = vmul.f32 %v474_v60, %v2714_v34  ;;  %v509_v42 = vsub.f32 1.5, %v508_v48 }
  0xf3   :  { %v612_v62 = vsel %vm610_vm13, %v611_v45, %v609_v63  ;;  %vm2910_vm7 = vcmp.eq.s32.totalorder %v766_v8, 0  ;;  %vm512_vm8 = vcmp.eq.f32.partialorder %v2683_v27, inf  ;;  %v568_v13 = vmul.f32 0.5, %v567_v54 }
  0xf4   :  { %v2917_v3 = vsel %vm2875_vm14, -inf, %v640_v57  ;;  %v652_v51 = vmul.f32 %v2675_v17, %v612_v62  ;;  %v477_v10 = vsel %vm476_vm15, %v2714_v34, %v475_v14  ;;  %v510_v0 = vmul.f32 %v2733_v55, %v509_v42 }
  0xf5   :  { %816 = vmax.xlane.f32.xlu0 %v2917_v3  ;;  %v480_v44 = vsel %vm478_vm6, %v479_v40, %v477_v10  ;;  %v769_v47 = vsub.s32 %v751_v53, %v2639_v59  ;;  %v569_v45 = vsub.f32 1.5, %v568_v13  ;;  %v756_v16 = vadd.s32 80, %v2637_v58 }
  0xf6   :  { %v2931_v43 = vsel %vm2885_vm0, -inf, %v652_v51  ;;  %v641_v4 = vmul.f32 %v2675_v17, %v480_v44  ;;  %v511_v29 = vmul.f32 %v510_v0, %v2683_v27  ;;  %v518_v55 = vmul.f32 %v2805_v1, %v2735_v20 }
  0xf7   :  { %840 = vmax.xlane.f32.xlu2 %v2931_v43  ;;  %vm514_vm9 = vcmp.eq.f32.partialorder %v2683_v27, 0.0  ;;  %v515_v34 = vand.u32 2147483648, %v2683_v27  ;;  %v570_v41 = vmul.f32 %v2835_v30, %v569_v45  ;;  %v774_v8 = vsub.s32 %v756_v16, %v2639_v59 }
  0xf8   :  { %v2944_v37 = vsel %vm2910_vm7, -inf, %v641_v4  ;;  %v513_v32 = vsel %vm512_vm8, %v2683_v27, %v511_v29  ;;  %vm572_vm10 = vcmp.eq.f32.partialorder %v2762_v56, inf  ;;  %v519_v33 = vmul.f32 %v2805_v1, %v518_v55 }
  0xf9   :  { %818 = vmax.xlane.f32.xlu1 %v2944_v37  ;;  %v516_v61 = vsel %vm514_vm9, %v515_v34, %v513_v32  ;;  %vm787_vm11 = vcmp.eq.s32.totalorder %v769_v47, 0  ;;  %v571_v30 = vmul.f32 %v570_v41, %v2762_v56  ;;  %v752_v60 = vadd.s32 48, %v2637_v58 }
  0xfa   :  { %v644_v48 = vmul.f32 %v2675_v17, %v516_v61  ;;  %v575_v9 = vand.u32 2147483648, %v2762_v56  ;;  %v520_v40 = vmul.f32 0.5, %v519_v33  ;;  %v614_v27 = vmul.f32 %v2849_v52, %v2770_v36 }
  0xfb   :  { %2130 = vrsqrt.f32 %v2828_v46  ;;  %v573_v53 = vsel %vm572_vm10, %v2762_v56, %v571_v30  ;;  %vm574_vm12 = vcmp.eq.f32.partialorder %v2762_v56, 0.0  ;;  %vm792_vm13 = vcmp.eq.s32.totalorder %v774_v8, 0 }
  0xfc   :  { %v2961_v54 = vsel %vm787_vm11, -inf, %v644_v48  ;;  %v576_v57 = vsel %vm574_vm12, %v575_v9, %v573_v53  ;;  %v521_v63 = vsub.f32 1.5, %v520_v40  ;;  %v615_v14 = vmul.f32 %v2849_v52, %v614_v27 }
  0xfd   :  { %2132 = vrsqrt.f32 %v2813_v39  ;;  %824 = vmax.xlane.f32.xlu0 %v2961_v54  ;;  %v649_v42 = vmul.f32 %v2675_v17, %v576_v57  ;;  %v770_v62 = vsub.s32 %v752_v60, %v2639_v59  ;;  %v482_v31 = vmul.f32 %v2857_v49, %v2777_v50 }
  0xfe   :  { %v522_v56 = vmul.f32 %v2805_v1, %v521_v63  ;;  %vm524_vm14 = vcmp.eq.f32.partialorder %v2735_v20, inf  ;;  %vm526_vm15 = vcmp.eq.f32.partialorder %v2735_v20, 0.0  ;;  %v616_v13 = vmul.f32 0.5, %v615_v14 }
  0xff   :  { %v2973_v51 = vsel %vm792_vm13, -inf, %v649_v42  ;;  %v527_v10 = vand.u32 2147483648, %v2735_v20  ;;  %v760_v0 = vadd.s32 112, %v2637_v58  ;;  %v483_v44 = vmul.f32 %v2857_v49, %v482_v31 }
 0x100   :  { %834 = vmax.xlane.f32.xlu2 %v2973_v51  ;;  %v523_v47 = vmul.f32 %v522_v56, %v2735_v20  ;;  %v617_v45 = vsub.f32 1.5, %v616_v13  ;;  %vm620_vm0 = vcmp.eq.f32.partialorder %v2770_v36, inf  ;;  %v626_v1 = vmul.f32 %v2869_v5, %v2808_v6 }
 0x101   :  { %v2131_v16 = vpop.eup %2130  ;;  %vm2983_vm6 = vcmp.eq.s32.totalorder %v770_v62, 0  ;;  %vm622_vm7 = vcmp.eq.f32.partialorder %v2770_v36, 0.0  ;;  %v623_v29 = vand.u32 2147483648, %v2770_v36  ;;  %v484_v55 = vmul.f32 0.5, %v483_v44 }
 0x102   :  { %v525_v34 = vsel %vm524_vm14, %v2735_v20, %v523_v47  ;;  %v618_v41 = vmul.f32 %v2849_v52, %v617_v45  ;;  %v749_v8 = vadd.s32 24, %v2637_v58  ;;  %v627_v32 = vmul.f32 %v2869_v5, %v626_v1 }
 0x103   :  { %v2133_v33 = vpop.eup %2132  ;;  %v528_v61 = vsel %vm526_vm15, %v527_v10, %v525_v34  ;;  %v778_v30 = vsub.s32 %v760_v0, %v2639_v59  ;;  %v485_v60 = vsub.f32 1.5, %v484_v55  ;;  %vm488_vm8 = vcmp.eq.f32.partialorder %v2777_v50, inf }
 0x104   :  { %v645_v48 = vmul.f32 %v2675_v17, %v528_v61  ;;  %v619_v9 = vmul.f32 %v618_v41, %v2770_v36  ;;  %v628_v40 = vmul.f32 0.5, %v627_v32  ;;  %v761_v52 = vadd.s32 120, %v2637_v58 }
 0x105   :  { %v486_v27 = vmul.f32 %v2857_v49, %v485_v60  ;;  %vm490_vm9 = vcmp.eq.f32.partialorder %v2777_v50, 0.0  ;;  %v491_v53 = vand.u32 2147483648, %v2777_v50  ;;  %v578_v20 = vmul.f32 %v2131_v16, %v2828_v46 }
 0x106   :  { %v3008_v57 = vsel %vm2983_vm6, -inf, %v645_v48  ;;  %v621_v63 = vsel %vm620_vm0, %v2770_v36, %v619_v9  ;;  %v767_v14 = vsub.s32 %v749_v8, %v2639_v59  ;;  %v629_v42 = vsub.f32 1.5, %v628_v40 }
 0x107   :  { %826 = vmax.xlane.f32.xlu1 %v3008_v57  ;;  %v624_v49 = vsel %vm622_vm7, %v623_v29, %v621_v63  ;;  %vm796_vm10 = vcmp.eq.s32.totalorder %v778_v30, 0  ;;  %v487_v62 = vmul.f32 %v486_v27, %v2777_v50  ;;  %v579_v31 = vmul.f32 %v2131_v16, %v578_v20 }
 0x108   :  { %v653_v56 = vmul.f32 %v2675_v17, %v624_v49  ;;  %v630_v13 = vmul.f32 %v2869_v5, %v629_v42  ;;  %v779_v10 = vsub.s32 %v761_v52, %v2639_v59  ;;  %v757_v0 = vadd.s32 88, %v2637_v58 }
 0x109   :  { %v489_v44 = vsel %vm488_vm8, %v2777_v50, %v487_v62  ;;  %vm632_vm11 = vcmp.eq.f32.partialorder %v2808_v6, inf  ;;  %v580_v36 = vmul.f32 0.5, %v579_v31  ;;  %v530_v47 = vmul.f32 %v2133_v33, %v2813_v39 }
 0x10a   :  { %v3027_v45 = vsel %vm796_vm10, -inf, %v653_v56  ;;  %v492_v1 = vsel %vm490_vm9, %v491_v53, %v489_v44  ;;  %vm785_vm12 = vcmp.eq.s32.totalorder %v767_v14, 0  ;;  %v631_v5 = vmul.f32 %v630_v13, %v2808_v6  ;;  %v3087_v56 = vpop.permute.xlu2 %711 }
 0x10b   :  { %842 = vmax.xlane.f32.xlu0 %v3027_v45  ;;  %v642_v4 = vmul.f32 %v2675_v17, %v492_v1  ;;  %v635_v29 = vand.u32 2147483648, %v2808_v6  ;;  %v581_v55 = vsub.f32 1.5, %v580_v36  ;;  %v531_v34 = vmul.f32 %v2133_v33, %v530_v47 }
 0x10c   :  { %v633_v41 = vsel %vm632_vm11, %v2808_v6, %v631_v5  ;;  %vm634_vm13 = vcmp.eq.f32.partialorder %v2808_v6, 0.0  ;;  %vm797_vm14 = vcmp.eq.s32.totalorder %v779_v10, 0  ;;  %v775_v8 = vsub.s32 %v757_v0, %v2639_v59  ;;  %v3091_v10 = vpop.permute.xlu0 %714 }
 0x10d   :  { %v3038_v50 = vsel %vm785_vm12, -inf, %v642_v4  ;;  %v636_v32 = vsel %vm634_vm13, %v635_v29, %v633_v41  ;;  %v582_v61 = vmul.f32 %v2131_v16, %v581_v55  ;;  %v532_v30 = vmul.f32 0.5, %v531_v34 }
 0x10e   :  { %820 = vmax.xlane.f32.xlu2 %v3038_v50  ;;  %v654_v60 = vmul.f32 %v2675_v17, %v636_v32  ;;  %v753_v48 = vadd.s32 56, %v2637_v58  ;;  %vm31_vm15 = vcmask 7168   ;;  %v2264_v52 = vmov -inf  }
 0x10f   :  { %v583_v9 = vmul.f32 %v582_v61, %v2828_v46  ;;  %v533_v40 = vsub.f32 1.5, %v532_v30  ;;  %32 = vst.msk [vmem:[#allocation2] sm:$0xff] %vm31_vm15, %v2264_v52  ;;  %vm584_vm0 = vcmp.eq.f32.partialorder %v2828_v46, inf  ;;  %v587_v16 = vand.u32 2147483648, %v2828_v46 }
 0x110   :  { %v3045_v6 = vsel %vm797_vm14, -inf, %v654_v60  ;;  %33 = vst.msk [vmem:[#allocation2 + $0x8] sm:$0xff] %vm31_vm15, %v2264_v52  ;;  %vm586_vm6 = vcmp.eq.f32.partialorder %v2828_v46, 0.0  ;;  %vm793_vm7 = vcmp.eq.s32.totalorder %v775_v8, 0  ;;  %v771_v20 = vsub.s32 %v753_v48, %v2639_v59 }
 0x111   :  { %844 = vmax.xlane.f32.xlu1 %v3045_v6  ;;  %v585_v27 = vsel %vm584_vm0, %v2828_v46, %v583_v9  ;;  %v534_v58 = vmul.f32 %v2133_v33, %v533_v40  ;;  %34 = vst.msk [vmem:[#allocation2 + $0x10] sm:$0xff] %vm31_vm15, %v2264_v52  ;;  %vm536_vm8 = vcmp.eq.f32.partialorder %v2813_v39, inf  ;;  %v539_v42 = vand.u32 2147483648, %v2813_v39 }
 0x112   :  { %v588_v53 = vsel %vm586_vm6, %v587_v16, %v585_v27  ;;  %35 = vst.msk [vmem:[#allocation2 + $0x18] sm:$0xff] %vm31_vm15, %v2264_v52  ;;  %vm538_vm9 = vcmp.eq.f32.partialorder %v2813_v39, 0.0  ;;  %vm789_vm10 = vcmp.eq.s32.totalorder %v771_v20, 0  ;;  %vm2265_vm12 = vmmov 1  }
 0x113   :  { %v650_v63 = vmul.f32 %v2675_v17, %v588_v53  ;;  %v535_v14 = vmul.f32 %v534_v58, %v2813_v39  ;;  %36 = vst.msk [vmem:[#allocation2 + $0x20] sm:$0xff] %vm31_vm15, %v2264_v52 }
 0x114   :  { %37 = vst.msk [vmem:[#allocation2 + $0x28] sm:$0xff] %vm31_vm15, %v2264_v52 }
 0x115   :  { %v3062_v46 = vsel %vm793_vm7, -inf, %v650_v63  ;;  %v537_v33 = vsel %vm536_vm8, %v2813_v39, %v535_v14  ;;  %38 = vst.msk [vmem:[#allocation2 + $0x30] sm:$0xff] %vm31_vm15, %v2264_v52 }
 0x116   :  { %836 = vmax.xlane.f32.xlu0 %v3062_v46  ;;  %v540_v59 = vsel %vm538_vm9, %v539_v42, %v537_v33  ;;  %39 = vst.msk [vmem:[#allocation2 + $0x38] sm:$0xff] %vm31_vm15, %v2264_v52  ;;  %v3089_v13 = vld [vmem:[#allocation2] sm:$0xff]  ;;  %v2266_v33 = vmov 0.0  }
 0x117   :  { %v646_v49 = vmul.f32 %v2675_v17, %v540_v59  ;;  %40 = vst.msk [vmem:[#allocation2 + $0x40] sm:$0xff] %vm31_vm15, %v2264_v52  ;;  %v3081_v17 = vpop.permute.xlu1 %690  ;;  %v3138_v53 = vld [vmem:[#allocation2 + $0x8] sm:$0xff] }
 0x118   :  { %41 = vst.msk [vmem:[#allocation2 + $0x48] sm:$0xff] %vm31_vm15, %v2264_v52 }
 0x119   :  { %v3072_v62 = vsel %vm789_vm10, -inf, %v646_v49  ;;  %42 = vst.msk [vmem:[#allocation2 + $0x50] sm:$0xff] %vm31_vm15, %v2264_v52 }
 0x11a   :  { %828 = vmax.xlane.f32.xlu2 %v3072_v62  ;;  %43 = vst.msk [vmem:[#allocation2 + $0x58] sm:$0xff] %vm31_vm15, %v2264_v52  ;;  %v3108_v34 = vld [vmem:[#allocation2 + $0x20] sm:$0xff] }
 0x11b   :  { %44 = vst.msk [vmem:[#allocation2 + $0x60] sm:$0xff] %vm31_vm15, %v2264_v52 }
 0x11c   :  { %45 = vst.msk [vmem:[#allocation2 + $0x68] sm:$0xff] %vm31_vm15, %v2264_v52 }
 0x11d   :  { %46 = vst.msk [vmem:[#allocation2 + $0x70] sm:$0xff] %vm31_vm15, %v2264_v52 }
 0x11e   :  { %47 = vst.msk [vmem:[#allocation2 + $0x78] sm:$0xff] %vm31_vm15, %v2264_v52  ;;  %v3098_v47 = vld [vmem:[#allocation2 + $0x40] sm:$0xff] }
 0x11f   :  { %v3083_v39 = vpop.permute.xlu1 %699  ;;  %v3130_v52 = vld [vmem:[#allocation2 + $0x48] sm:$0xff]  ;;  %64 = vst.msk [vmem:[#allocation4] sm:$0xff] %vm31_vm15, %v2266_v33 }
 0x120   :  { %48 = vst.msk [vmem:[#allocation3] sm:$0xff] %vm31_vm15, %v2266_v33 }
 0x121   :  { %49 = vst.msk [vmem:[#allocation3 + $0x8] sm:$0xff] %vm31_vm15, %v2266_v33 }
 0x122   :  { %v3105_v4 = vld [vmem:[#allocation2 + $0x60] sm:$0xff]  ;;  %50 = vst.msk [vmem:[#allocation3 + $0x10] sm:$0xff] %vm31_vm15, %v2266_v33 }
 0x123   :  { %v3144_v42 = vld [vmem:[#allocation2 + $0x68] sm:$0xff]  ;;  %51 = vst.msk [vmem:[#allocation3 + $0x18] sm:$0xff] %vm31_vm15, %v2266_v33 }
 0x124   :  { %52 = vst.msk [vmem:[#allocation3 + $0x20] sm:$0xff] %vm31_vm15, %v2266_v33 }
 0x125   :  { %53 = vst.msk [vmem:[#allocation3 + $0x28] sm:$0xff] %vm31_vm15, %v2266_v33  ;;  %v3248_v5 = vld [vmem:[#allocation2 + $0x78] sm:$0xff] }
 0x126   :  { %54 = vst.msk [vmem:[#allocation3 + $0x30] sm:$0xff] %vm31_vm15, %v2266_v33 }
 0x127   :  { %v3085_v31 = vpop.permute.xlu1 %708  ;;  %55 = vst.msk [vmem:[#allocation3 + $0x38] sm:$0xff] %vm31_vm15, %v2266_v33 }
 0x128   :  { %56 = vst.msk [vmem:[#allocation3 + $0x40] sm:$0xff] %vm31_vm15, %v2266_v33 }
 0x129   :  { %57 = vst.msk [vmem:[#allocation3 + $0x48] sm:$0xff] %vm31_vm15, %v2266_v33 }
 0x12a   :  { %58 = vst.msk [vmem:[#allocation3 + $0x50] sm:$0xff] %vm31_vm15, %v2266_v33 }
 0x12b   :  { %59 = vst.msk [vmem:[#allocation3 + $0x58] sm:$0xff] %vm31_vm15, %v2266_v33 }
 0x12c   :  { %60 = vst.msk [vmem:[#allocation3 + $0x60] sm:$0xff] %vm31_vm15, %v2266_v33 }
 0x12d   :  { %61 = vst.msk [vmem:[#allocation3 + $0x68] sm:$0xff] %vm31_vm15, %v2266_v33 }
 0x12e   :  { %62 = vst.msk [vmem:[#allocation3 + $0x70] sm:$0xff] %vm31_vm15, %v2266_v33 }
 0x12f   :  { %v3093_v44 = vpop.permute.xlu1 %717  ;;  %63 = vst.msk [vmem:[#allocation3 + $0x78] sm:$0xff] %vm31_vm15, %v2266_v33 }
 0x130   :  { %65 = vst.msk [vmem:[#allocation4 + $0x8] sm:$0xff] %vm31_vm15, %v2266_v33 }
 0x131   :  { %66 = vst.msk [vmem:[#allocation4 + $0x10] sm:$0xff] %vm31_vm15, %v2266_v33 }
 0x132   :  { %3577 = vst [vmem:[#allocation11_spill] sm:$0xff] %v3248_v5 }
 0x133   :  { %67 = vst.msk [vmem:[#allocation4 + $0x18] sm:$0xff] %vm31_vm15, %v2266_v33 }
 0x134   :  { %68 = vst.msk [vmem:[#allocation4 + $0x20] sm:$0xff] %vm31_vm15, %v2266_v33 }
 0x135   :  { %69 = vst.msk [vmem:[#allocation4 + $0x28] sm:$0xff] %vm31_vm15, %v2266_v33 }
 0x136   :  { %70 = vst.msk [vmem:[#allocation4 + $0x30] sm:$0xff] %vm31_vm15, %v2266_v33 }
 0x137   :  { %71 = vst.msk [vmem:[#allocation4 + $0x38] sm:$0xff] %vm31_vm15, %v2266_v33 }
 0x138   :  { %72 = vst.msk [vmem:[#allocation4 + $0x40] sm:$0xff] %vm31_vm15, %v2266_v33 }
 0x139   :  { %73 = vst.msk [vmem:[#allocation4 + $0x48] sm:$0xff] %vm31_vm15, %v2266_v33 }
 0x13a   :  { %74 = vst.msk [vmem:[#allocation4 + $0x50] sm:$0xff] %vm31_vm15, %v2266_v33 }
 0x13b   :  { %75 = vst.msk [vmem:[#allocation4 + $0x58] sm:$0xff] %vm31_vm15, %v2266_v33 }
 0x13c   :  { %76 = vst.msk [vmem:[#allocation4 + $0x60] sm:$0xff] %vm31_vm15, %v2266_v33 }
 0x13d   :  { %77 = vst.msk [vmem:[#allocation4 + $0x68] sm:$0xff] %vm31_vm15, %v2266_v33 }
 0x13e   :  { %78 = vst.msk [vmem:[#allocation4 + $0x70] sm:$0xff] %vm31_vm15, %v2266_v33 }
 0x13f   :  { %79 = vst.msk [vmem:[#allocation4 + $0x78] sm:$0xff] %vm31_vm15, %v2266_v33  ;;  %v3322_v33 = vld [vmem:[%s3538_s6] ss:$0 sm:$0xff] }
 0x150   :  { %v815_v0 = vpop.xlane.xlu2 %814 }
 0x151   :  { %v862_v36 = vmax.f32 %v3089_v13, %v815_v0  ;;  %v3151_v0 = vld [vmem:[#allocation2 + $0x10] sm:$0xff] }
 0x153   :  { %1311 = vst.msk [vmem:[#allocation2] sm:$0xff] %vm31_vm15, %v862_v36  ;;  %vm878_vm11 = vweird.f32 %v862_v36 }
 0x154   :  { %vm894_vm13 = vmxor %vm878_vm11, %vm2265_vm12 }
 0x155   :  { %v3100_v1 = vsel %vm894_vm13, %v862_v36, 0.0 }
 0x156   :  { %976 = vperm.xlu2 %2099, %v3100_v1  }
 0x157   :  { %v831_v29 = vpop.xlane.xlu0 %830 }
 0x158   :  { %v870_v55 = vmax.f32 %v3098_v47, %v831_v29  ;;  %v839_v41 = vpop.xlane.xlu1 %838 }
 0x159   :  { %v874_v8 = vmax.f32 %v3105_v4, %v839_v41  ;;  %v823_v32 = vpop.xlane.xlu2 %822 }
 0x15a   :  { %1319 = vst.msk [vmem:[#allocation2 + $0x40] sm:$0xff] %vm31_vm15, %v870_v55  ;;  %vm886_vm14 = vweird.f32 %v870_v55  ;;  %v866_v61 = vmax.f32 %v3108_v34, %v823_v32  ;;  %v3167_v32 = vld [vmem:[#allocation2 + $0x28] sm:$0xff] }
 0x15b   :  { %vm902_vm0 = vmxor %vm886_vm14, %vm2265_vm12  ;;  %1323 = vst.msk [vmem:[#allocation2 + $0x60] sm:$0xff] %vm31_vm15, %v874_v8  ;;  %vm890_vm6 = vweird.f32 %v874_v8 }
 0x15c   :  { %v3115_v30 = vsel %vm902_vm0, %v870_v55, 0.0  ;;  %1315 = vst.msk [vmem:[#allocation2 + $0x20] sm:$0xff] %vm31_vm15, %v866_v61  ;;  %vm906_vm7 = vmxor %vm890_vm6, %vm2265_vm12  ;;  %vm882_vm8 = vweird.f32 %v866_v61 }
 0x15d   :  { %1016 = vperm.xlu1 %2098, %v3115_v30   ;;  %v3122_v48 = vsel %vm906_vm7, %v874_v8, 0.0  ;;  %vm898_vm9 = vmxor %vm882_vm8, %vm2265_vm12  ;;  %v3235_v8 = vld [vmem:[#allocation2 + $0x18] sm:$0xff] }
 0x15e   :  { %1036 = vperm.xlu0 %2097, %v3122_v48   ;;  %v3128_v40 = vsel %vm898_vm9, %v866_v61, 0.0  ;;  %3575 = vst [vmem:[#allocation9_spill] sm:$0xff] %v3235_v8 }
 0x15f   :  { %996 = vperm.xlu2 %2099, %v3128_v40   ;;  %v3584_v24 = vsub.f32 %v3108_v34, %v3128_v40  ;;  %v1203_v34 = vld [vmem:[#allocation3 + $0x20] sm:$0xff] }
 0x162   :  { %v833_v27 = vpop.xlane.xlu1 %832 }
 0x163   :  { %v871_v58 = vmax.f32 %v3130_v52, %v833_v27 }
 0x165   :  { %1320 = vst.msk [vmem:[#allocation2 + $0x48] sm:$0xff] %vm31_vm15, %v871_v58  ;;  %vm887_vm10 = vweird.f32 %v871_v58 }
 0x166   :  { %vm903_vm11 = vmxor %vm887_vm10, %vm2265_vm12 }
 0x167   :  { %v3140_v20 = vsel %vm903_vm11, %v871_v58, 0.0 }
 0x168   :  { %v817_v14 = vpop.xlane.xlu0 %816 }
 0x169   :  { %v863_v59 = vmax.f32 %v3138_v53, %v817_v14 }
 0x16a   :  { %v841_v49 = vpop.xlane.xlu2 %840 }
 0x16b   :  { %1312 = vst.msk [vmem:[#allocation2 + $0x8] sm:$0xff] %vm31_vm15, %v863_v59  ;;  %v875_v36 = vmax.f32 %v3144_v42, %v841_v49  ;;  %vm879_vm13 = vweird.f32 %v863_v59 }
 0x16c   :  { %vm895_vm14 = vmxor %vm879_vm13, %vm2265_vm12  ;;  %v819_v29 = vpop.xlane.xlu1 %818 }
 0x16d   :  { %1324 = vst.msk [vmem:[#allocation2 + $0x68] sm:$0xff] %vm31_vm15, %v875_v36  ;;  %v3161_v55 = vsel %vm895_vm14, %v863_v59, 0.0  ;;  %v864_v41 = vmax.f32 %v3151_v0, %v819_v29  ;;  %vm891_vm0 = vweird.f32 %v875_v36  ;;  %v3182_v59 = vld [vmem:[#allocation2 + $0x50] sm:$0xff] }
 0x16e   :  { %981 = vperm.xlu0 %2097, %v3161_v55   ;;  %vm907_vm6 = vmxor %vm891_vm0, %vm2265_vm12  ;;  %3572 = vst [vmem:[#allocation6_spill] sm:$0xff] %v3182_v59 }
 0x16f   :  { %1313 = vst.msk [vmem:[#allocation2 + $0x10] sm:$0xff] %vm31_vm15, %v864_v41  ;;  %v3173_v61 = vsel %vm907_vm6, %v875_v36, 0.0  ;;  %vm880_vm7 = vweird.f32 %v864_v41 }
 0x170   :  { %v825_v27 = vpop.xlane.xlu0 %824  ;;  %1041 = vperm.xlu2 %2099, %v3173_v61   ;;  %vm896_vm8 = vmxor %vm880_vm7, %vm2265_vm12 }
 0x171   :  { %v867_v14 = vmax.f32 %v3167_v32, %v825_v27  ;;  %v3184_v49 = vsel %vm896_vm8, %v864_v41, 0.0 }
 0x173   :  { %1316 = vst.msk [vmem:[#allocation2 + $0x28] sm:$0xff] %vm31_vm15, %v867_v14  ;;  %v835_v29 = vpop.xlane.xlu2 %834  ;;  %vm883_vm9 = vweird.f32 %v867_v14 }
 0x174   :  { %v872_v63 = vmax.f32 %v3182_v59, %v835_v29  ;;  %vm899_vm10 = vmxor %vm883_vm9, %vm2265_vm12  ;;  %v3270_v59 = vld [vmem:[#allocation2 + $0x58] sm:$0xff] }
 0x175   :  { %v3197_v41 = vsel %vm899_vm10, %v867_v14, 0.0  ;;  %v3209_v14 = vld [vmem:[#allocation2 + $0x30] sm:$0xff]  ;;  %3580 = vst [vmem:[#allocation14_spill] sm:$0xff] %v3270_v59 }
 0x176   :  { %1321 = vst.msk [vmem:[#allocation2 + $0x50] sm:$0xff] %vm31_vm15, %v872_v63  ;;  %1021 = vperm.xlu0 %2097, %v3140_v20   ;;  %1001 = vperm.xlu1 %2098, %v3197_v41   ;;  %vm888_vm11 = vweird.f32 %v872_v63 }
 0x177   :  { %vm904_vm13 = vmxor %vm888_vm11, %vm2265_vm12 }
 0x178   :  { %v3211_v29 = vsel %vm904_vm13, %v872_v63, 0.0  ;;  %v3225_v63 = vld [vmem:[#allocation2 + $0x70] sm:$0xff] }
 0x179   :  { %3573 = vst [vmem:[#allocation7_spill] sm:$0xff] %v3211_v29  ;;  %1026 = vperm.xlu2 %2099, %v3211_v29   ;;  %v3287_v29 = vld [vmem:[#allocation2 + $0x38] sm:$0xff] }
 0x17a   :  { %v827_v27 = vpop.xlane.xlu1 %826  ;;  %3574 = vst [vmem:[#allocation8_spill] sm:$0xff] %v3225_v63 }
 0x17b   :  { %v868_v58 = vmax.f32 %v3209_v14, %v827_v27 }
 0x17d   :  { %1317 = vst.msk [vmem:[#allocation2 + $0x30] sm:$0xff] %vm31_vm15, %v868_v58  ;;  %vm884_vm14 = vweird.f32 %v868_v58 }
 0x17e   :  { %v843_v36 = vpop.xlane.xlu0 %842  ;;  %vm900_vm0 = vmxor %vm884_vm14, %vm2265_vm12  ;;  %986 = vperm.xlu1 %2098, %v3184_v49  }
 0x17f   :  { %v876_v27 = vmax.f32 %v3225_v63, %v843_v36  ;;  %v3237_v9 = vsel %vm900_vm0, %v868_v58, 0.0 }
 0x180   :  { %3576 = vst [vmem:[#allocation10_spill] sm:$0xff] %v3237_v9  ;;  %1006 = vperm.xlu0 %2097, %v3237_v9  }
 0x181   :  { %1325 = vst.msk [vmem:[#allocation2 + $0x70] sm:$0xff] %vm31_vm15, %v876_v27  ;;  %v821_v16 = vpop.xlane.xlu2 %820  ;;  %vm892_vm6 = vweird.f32 %v876_v27 }
 0x182   :  { %v865_v36 = vmax.f32 %v3235_v8, %v821_v16  ;;  %vm908_vm7 = vmxor %vm892_vm6, %vm2265_vm12 }
 0x183   :  { %v3253_v58 = vsel %vm908_vm7, %v876_v27, 0.0  ;;  %vm720_vm7 = vcmp.eq.s32.totalorder %v2598_v21, %v3322_v33 }
 0x184   :  { %3578 = vst [vmem:[#allocation12_spill] sm:$0xff] %v3253_v58  ;;  %v845_v60 = vpop.xlane.xlu1 %844  ;;  %vm881_vm8 = vweird.f32 %v865_v36 }
 0x185   :  { %1314 = vst.msk [vmem:[#allocation2 + $0x18] sm:$0xff] %vm31_vm15, %v865_v36  ;;  %v877_v16 = vmax.f32 %v3248_v5, %v845_v60  ;;  %vm897_vm9 = vmxor %vm881_vm8, %vm2265_vm12  ;;  %vm732_vm8 = vcmp.eq.s32.totalorder %v3085_v31, %v3322_v33 }
 0x186   :  { %1046 = vperm.xlu1 %2098, %v3253_v58   ;;  %v3265_v27 = vsel %vm897_vm9, %v865_v36, 0.0  ;;  %vm728_vm9 = vcmp.eq.s32.totalorder %v2614_v26, %v3322_v33 }
 0x187   :  { %3579 = vst [vmem:[#allocation13_spill] sm:$0xff] %v3265_v27  ;;  %vm893_vm10 = vweird.f32 %v877_v16 }
 0x188   :  { %1326 = vst.msk [vmem:[#allocation2 + $0x78] sm:$0xff] %vm31_vm15, %v877_v16  ;;  %991 = vperm.xlu0 %2097, %v3265_v27   ;;  %vm909_vm11 = vmxor %vm893_vm10, %vm2265_vm12  ;;  %vm725_vm10 = vcmp.eq.s32.totalorder %v2612_v25, %v3322_v33 }
 0x189   :  { %v837_v60 = vpop.xlane.xlu0 %836  ;;  %v3278_v36 = vsel %vm909_vm11, %v877_v16, 0.0  ;;  %vm721_vm11 = vcmp.eq.s32.totalorder %v2579_v12, %v3322_v33 }
 0x18a   :  { %3581 = vst [vmem:[#allocation15_spill] sm:$0xff] %v3278_v36  ;;  %v873_v58 = vmax.f32 %v3270_v59, %v837_v60 }
 0x18c   :  { %1322 = vst.msk [vmem:[#allocation2 + $0x58] sm:$0xff] %vm31_vm15, %v873_v58  ;;  %vm889_vm13 = vweird.f32 %v873_v58 }
 0x18d   :  { %v829_v16 = vpop.xlane.xlu2 %828  ;;  %vm905_vm14 = vmxor %vm889_vm13, %vm2265_vm12  ;;  %vm729_vm13 = vcmp.eq.s32.totalorder %v3083_v39, %v3322_v33 }
 0x18e   :  { %v869_v60 = vmax.f32 %v3287_v29, %v829_v16  ;;  %v3296_v63 = vsel %vm905_vm14, %v873_v58, 0.0  ;;  %vm726_vm14 = vcmp.eq.s32.totalorder %v3081_v17, %v3322_v33 }
 0x18f   :  { %3582 = vst [vmem:[#allocation16_spill] sm:$0xff] %v3296_v63  ;;  %1031 = vperm.xlu1 %2098, %v3296_v63  }
 0x190   :  { %1318 = vst.msk [vmem:[#allocation2 + $0x38] sm:$0xff] %vm31_vm15, %v869_v60  ;;  %vm885_vm0 = vweird.f32 %v869_v60  ;;  %1051 = vperm.xlu0 %2097, %v3278_v36  }
 0x191   :  { %vm901_vm6 = vmxor %vm885_vm0, %vm2265_vm12  ;;  %vm724_vm12 = vcmp.eq.s32.totalorder %v2583_v15, %v3322_v33 }
 0x192   :  { %v3310_v58 = vsel %vm901_vm6, %v869_v60, 0.0 }
 0x193   :  { %1011 = vperm.xlu2 %2099, %v3310_v58  }
 0x1b0   :  { %v977_v5 = vpop.permute.xlu2 %976 }
 0x1b1   :  { %v1054_v63 = vsub.f32 %v2753_v35, %v977_v5 }
 0x1b3   :  { %v1070_v59 = vmul.f32 1.442695, %v1054_v63 }
 0x1b5   :  { %2134 = vpow2.f32 %v1070_v59 }
 0x1b9   :  { %v997_v36 = vpop.permute.xlu2 %996 }
 0x1ba   :  { %v1058_v8 = vsub.f32 %v2824_v2, %v997_v36 }
 0x1bb   :  { %v2135_v27 = vpop.eup %2134 }
 0x1bc   :  { %v1078_v9 = vmul.f32 1.442695, %v1058_v8  ;;  %1134 = vadd.xlane.f32.xlu2 %v2135_v27  ;;  %v1231_v5 = vsel %vm720_vm7, %v2135_v27, 0.0 }
 0x1be   :  { %2136 = vpow2.f32 %v1078_v9 }
 0x1c4   :  { %v2137_v60 = vpop.eup %2136 }
 0x1c5   :  { %1142 = vadd.xlane.f32.xlu1 %v2137_v60  ;;  %v1235_v35 = vsel %vm724_vm12, %v2137_v60, 0.0 }
 0x1c6   :  { %1255 = vadd.xlane.f32.xlu0 %v1235_v35 }
 0x1ca   :  { %v1042_v60 = vpop.permute.xlu2 %1041 }
 0x1cd   :  { %1247 = vadd.xlane.f32.xlu1 %v1231_v5  ;;  %v1067_v5 = vsub.f32 %v2931_v43, %v1042_v60 }
 0x1cf   :  { %v1017_v2 = vpop.permute.xlu1 %1016 }
 0x1d0   :  { %v1062_v9 = vsub.f32 %v2799_v7, %v1017_v2  ;;  %v1037_v8 = vpop.permute.xlu0 %1036  ;;  %v1096_v2 = vmul.f32 1.442695, %v1067_v5 }
 0x1d1   :  { %v1066_v63 = vsub.f32 %v2817_v11, %v1037_v8 }
 0x1d2   :  { %v1086_v59 = vmul.f32 1.442695, %v1062_v9 }
 0x1d3   :  { %v1094_v36 = vmul.f32 1.442695, %v1066_v63 }
 0x1d4   :  { %2138 = vpow2.f32 %v1086_v59 }
 0x1d5   :  { %2140 = vpow2.f32 %v1094_v36 }
 0x1da   :  { %v2139_v16 = vpop.eup %2138 }
 0x1db   :  { %1150 = vadd.xlane.f32.xlu0 %v2139_v16  ;;  %v2141_v15 = vpop.eup %2140  ;;  %v1239_v35 = vsel %vm728_vm9, %v2139_v16, 0.0 }
 0x1dc   :  { %1158 = vadd.xlane.f32.xlu2 %v2141_v15  ;;  %v1243_v21 = vsel %vm732_vm8, %v2141_v15, 0.0 }
 0x1dd   :  { %1271 = vadd.xlane.f32.xlu1 %v1243_v21 }
 0x1e0   :  { %v982_v27 = vpop.permute.xlu0 %981 }
 0x1e1   :  { %v1055_v7 = vsub.f32 %v2917_v3, %v982_v27 }
 0x1e3   :  { %v1072_v11 = vmul.f32 1.442695, %v1055_v7  ;;  %v1027_v7 = vpop.permute.xlu2 %1026 }
 0x1e4   :  { %1263 = vadd.xlane.f32.xlu2 %v1239_v35  ;;  %v1064_v5 = vsub.f32 %v2973_v51, %v1027_v7  ;;  %v3583_v7 = vsub.f32 %v3089_v13, %v3100_v1  ;;  %v950_v13 = vmul.f32 1.442695, %v3584_v24  ;;  %v3587_v24 = vsub.f32 %v3138_v53, %v3161_v55 }
 0x1e5   :  { %2142 = vpow2.f32 %v1072_v11  ;;  %v3588_v55 = vsub.f32 %v3144_v42, %v3173_v61 }
 0x1e6   :  { %2144 = vpow2.f32 %v1096_v2 }
 0x1e8   :  { %v1002_v9 = vpop.permute.xlu1 %1001  ;;  %v1022_v8 = vpop.permute.xlu0 %1021 }
 0x1e9   :  { %v1059_v31 = vsub.f32 %v2961_v54, %v1002_v9  ;;  %v1063_v59 = vsub.f32 %v2873_v38, %v1022_v8  ;;  %v1090_v9 = vmul.f32 1.442695, %v1064_v5 }
 0x1eb   :  { %v2143_v63 = vpop.eup %2142  ;;  %v1080_v36 = vmul.f32 1.442695, %v1059_v31  ;;  %v1088_v3 = vmul.f32 1.442695, %v1063_v59 }
 0x1ec   :  { %1136 = vadd.xlane.f32.xlu1 %v2143_v63  ;;  %v3338_v15 = vpop.eup %2144 }
 0x1ed   :  { %2146 = vpow2.f32 %v1080_v36  ;;  %v1012_v12 = vpop.permute.xlu2 %1011 }
 0x1ee   :  { %2148 = vpow2.f32 %v1088_v3  ;;  %v1061_v51 = vsub.f32 %v3072_v62, %v1012_v12 }
 0x1f0   :  { %v987_v26 = vpop.permute.xlu1 %986 }
 0x1f1   :  { %v1056_v38 = vsub.f32 %v2944_v37, %v987_v26 }
 0x1f2   :  { %v1007_v43 = vpop.permute.xlu0 %1006 }
 0x1f3   :  { %v2147_v16 = vpop.eup %2146  ;;  %v1060_v21 = vsub.f32 %v3008_v57, %v1007_v43  ;;  %v1074_v11 = vmul.f32 1.442695, %v1056_v38  ;;  %v1232_v57 = vsel %vm721_vm11, %v2143_v63, 0.0  ;;  %v1084_v63 = vmul.f32 1.442695, %v1061_v51 }
 0x1f4   :  { %1144 = vadd.xlane.f32.xlu0 %v2147_v16  ;;  %v1236_v54 = vsel %vm725_vm10, %v2147_v16, 0.0  ;;  %1160 = vadd.xlane.f32.xlu1 %v3338_v15  ;;  %v2149_v60 = vpop.eup %2148  ;;  %v3586_v51 = vsub.f32 %v3105_v4, %v3122_v48  ;;  %v1114_v48 = vld [vmem:[#allocation4 + $0x60] sm:$0xff] }
 0x1f5   :  { %1257 = vadd.xlane.f32.xlu2 %v1236_v54  ;;  %v1082_v27 = vmul.f32 1.442695, %v1060_v21  ;;  %v1240_v35 = vsel %vm729_vm13, %v2149_v60, 0.0 }
 0x1f7   :  { %2150 = vpow2.f32 %v1082_v27 }
 0x1f8   :  { %v1047_v25 = vpop.permute.xlu1 %1046  ;;  %2152 = vpow2.f32 %v1074_v11  ;;  %v942_v11 = vmul.f32 1.442695, %v3583_v7 }
 0x1f9   :  { %v1068_v37 = vsub.f32 %v3027_v45, %v1047_v25  ;;  %2154 = vpow2.f32 %v1090_v9 }
 0x1fa   :  { %v992_v31 = vpop.permute.xlu0 %991 }
 0x1fb   :  { %v1098_v8 = vmul.f32 1.442695, %v1068_v37  ;;  %v1057_v45 = vsub.f32 %v3038_v50, %v992_v31  ;;  %v1106_v37 = vld [vmem:[#allocation4 + $0x20] sm:$0xff]  ;;  %v3585_v31 = vsub.f32 %v3098_v47, %v3115_v30 }
 0x1fc   :  { %1249 = vadd.xlane.f32.xlu0 %v1232_v57  ;;  %1265 = vadd.xlane.f32.xlu1 %v1240_v35  ;;  %v1102_v57 = vld [vmem:[#allocation4] sm:$0xff] }
 0x1fd   :  { %1152 = vadd.xlane.f32.xlu2 %v2149_v60  ;;  %v2151_v2 = vpop.eup %2150  ;;  %2156 = vpow2.f32 %v1098_v8  ;;  %v1076_v3 = vmul.f32 1.442695, %v1057_v45  ;;  %v958_v12 = vmul.f32 1.442695, %v3585_v31  ;;  %v966_v45 = vmul.f32 1.442695, %v3586_v51 }
 0x1fe   :  { %v2153_v39 = vpop.eup %2152  ;;  %v1237_v59 = vsel %vm726_vm14, %v2151_v2, 0.0  ;;  %2158 = vpow2.f32 %v1084_v63  ;;  %v1110_v47 = vld [vmem:[#allocation4 + $0x40] sm:$0xff] }
 0x1ff   :  { %v2155_v36 = vpop.eup %2154  ;;  %v1233_v17 = vsel %vm722_vm3, %v2153_v39, 0.0  ;;  %2160 = vpow2.f32 %v1076_v3  ;;  %vm734_vm3 = vcmp.eq.s32.totalorder %v3091_v10, %v3322_v33 }
 0x200   :  { %v1241_v38 = vsel %vm730_vm2, %v2155_v36, 0.0  ;;  %vm735_vm2 = vcmp.eq.s32.totalorder %v3093_v44, %v3322_v33 }
 0x201   :  { %v1032_v16 = vpop.permute.xlu1 %1031 }
 0x202   :  { %v1052_v43 = vpop.permute.xlu0 %1051  ;;  %v1065_v50 = vsub.f32 %v3062_v46, %v1032_v16 }
 0x203   :  { %v2157_v26 = vpop.eup %2156  ;;  %v1069_v62 = vsub.f32 %v3045_v6, %v1052_v43 }
 0x204   :  { %1138 = vadd.xlane.f32.xlu0 %v2153_v39  ;;  %1259 = vadd.xlane.f32.xlu1 %v1237_v59  ;;  %v2159_v54 = vpop.eup %2158  ;;  %v1092_v23 = vmul.f32 1.442695, %v1065_v50  ;;  %v1245_v18 = vsel %vm734_vm3, %v2157_v26, 0.0  ;;  %v1211_v50 = vld [vmem:[#allocation3 + $0x60] sm:$0xff] }
 0x205   :  { %1146 = vadd.xlane.f32.xlu2 %v2151_v2  ;;  %v1100_v21 = vmul.f32 1.442695, %v1069_v62  ;;  %v2161_v27 = vpop.eup %2160  ;;  %v1238_v6 = vsel %vm727_vm1, %v2159_v54, 0.0  ;;  %vm733_vm1 = vcmp.eq.s32.totalorder %v3087_v56, %v3322_v33 }
 0x206   :  { %v1234_v60 = vsel %vm723_vm4, %v2161_v27, 0.0  ;;  %v1244_v44 = vsel %vm733_vm1, %v3338_v15, 0.0  ;;  %v1199_v15 = vld [vmem:[#allocation3] sm:$0xff] }
 0x207   :  { %2162 = vpow2.f32 %v1100_v21 }
 0x208   :  { %2164 = vpow2.f32 %v1092_v23 }
 0x209   :  { %2166 = vpow2.f32 %v942_v11 }
 0x20a   :  { %2168 = vpow2.f32 %v950_v13  ;;  %v944_v13 = vmul.f32 1.442695, %v3587_v24 }
 0x20b   :  { %2170 = vpow2.f32 %v958_v12 }
 0x20c   :  { %1162 = vadd.xlane.f32.xlu0 %v2157_v26  ;;  %1154 = vadd.xlane.f32.xlu1 %v2155_v36 }
 0x20d   :  { %1251 = vadd.xlane.f32.xlu2 %v1233_v17  ;;  %v2163_v46 = vpop.eup %2162 }
 0x20e   :  { %v2165_v22 = vpop.eup %2164  ;;  %v1246_v25 = vsel %vm735_vm2, %v2163_v46, 0.0 }
 0x20f   :  { %v1242_v19 = vsel %vm731_vm5, %v2165_v22, 0.0  ;;  %v2167_v1 = vpop.eup %2166 }
 0x210   :  { %v1118_v28 = vmul.f32 %v2167_v1, %v1102_v57  ;;  %v2169_v56 = vpop.eup %2168  ;;  %v1215_v39 = vmul.f32 %v2167_v1, %v1199_v15 }
 0x211   :  { %v1122_v40 = vmul.f32 %v2169_v56, %v1106_v37  ;;  %v1219_v9 = vmul.f32 %v2169_v56, %v1203_v34  ;;  %v2171_v43 = vpop.eup %2170  ;;  %v968_v56 = vmul.f32 1.442695, %v3588_v55  ;;  %v3589_v34 = vsub.f32 %v3167_v32, %v3197_v41 }
 0x212   :  { %v3590_v32 = vsub.f32 %v3130_v52, %v3140_v20 }
 0x214   :  { %1267 = vadd.xlane.f32.xlu0 %v1241_v38  ;;  %1148 = vadd.xlane.f32.xlu1 %v2159_v54  ;;  %v1126_v54 = vmul.f32 %v2171_v43, %v1110_v47  ;;  %v960_v41 = vmul.f32 1.442695, %v3590_v32 }
 0x215   :  { %1140 = vadd.xlane.f32.xlu2 %v2161_v27 }
 0x21c   :  { %1261 = vadd.xlane.f32.xlu0 %v1238_v6  ;;  %1253 = vadd.xlane.f32.xlu1 %v1234_v60 }
 0x21d   :  { %1164 = vadd.xlane.f32.xlu2 %v2163_v46 }
 0x224   :  { %1156 = vadd.xlane.f32.xlu0 %v2165_v22  ;;  %1277 = vadd.xlane.f32.xlu1 %v1246_v25 }
 0x225   :  { %1269 = vadd.xlane.f32.xlu2 %v1242_v19 }
 0x22c   :  { %1273 = vadd.xlane.f32.xlu0 %v1244_v44 }
 0x22d   :  { %1275 = vadd.xlane.f32.xlu2 %v1245_v18  ;;  %v1207_v18 = vld [vmem:[#allocation3 + $0x40] sm:$0xff] }
 0x22f   :  { %v1135_v35 = vpop.xlane.xlu2 %1134 }
 0x230   :  { %v1166_v5 = vadd.f32 %v1135_v35, %v1118_v28 }
 0x232   :  { %1183 = vst.msk [vmem:[#allocation4] sm:$0xff] %vm31_vm15, %v1166_v5  ;;  %v1223_v5 = vmul.f32 %v2171_v43, %v1207_v18  ;;  %v1204_v43 = vld [vmem:[#allocation3 + $0x28] sm:$0xff] }
 0x238   :  { %v1143_v2 = vpop.xlane.xlu1 %1142 }
 0x239   :  { %v1170_v8 = vadd.f32 %v1143_v2, %v1122_v40  ;;  %v1256_v10 = vpop.xlane.xlu0 %1255  ;;  %v1862_v26 = vld [vmem:[#allocation4] sm:$0xff]  ;;  %v952_v40 = vmul.f32 1.442695, %v3589_v34 }
 0x23a   :  { %v1283_v33 = vadd.f32 %v1256_v10, %v1219_v9  ;;  %v1103_v10 = vld [vmem:[#allocation4 + $0x8] sm:$0xff] }
 0x23b   :  { %1187 = vst.msk [vmem:[#allocation4 + $0x20] sm:$0xff] %vm31_vm15, %v1170_v8 }
 0x23c   :  { %1299 = vst.msk [vmem:[#allocation3 + $0x20] sm:$0xff] %vm31_vm15, %v1283_v33 }
 0x240   :  { %v1248_v59 = vpop.xlane.xlu1 %1247 }
 0x241   :  { %v1279_v63 = vadd.f32 %v1248_v59, %v1215_v39 }
 0x242   :  { %v1866_v36 = vld [vmem:[#allocation4 + $0x20] sm:$0xff] }
 0x243   :  { %2172 = vlog2.f32 %v1866_v36  ;;  %v1850_v3 = vld [vmem:[#allocation3 + $0x20] sm:$0xff]  ;;  %1295 = vst.msk [vmem:[#allocation3] sm:$0xff] %vm31_vm15, %v1279_v63  ;;  %v1107_v36 = vld [vmem:[#allocation4 + $0x28] sm:$0xff] }
 0x244   :  { %2174 = vlog2.f32 %v1850_v3  ;;  %vm1882_vm4 = vcmp.gt.f32.partialorder %v1850_v3, 0.0  ;;  %v1115_v3 = vld [vmem:[#allocation4 + $0x68] sm:$0xff] }
 0x245   :  { %2176 = vpow2.f32 %v966_v45 }
 0x246   :  { %2178 = vlog2.f32 %v1862_v26 }
 0x249   :  { %v2173_v17 = vpop.eup %2172 }
 0x24a   :  { %v2175_v30 = vpop.eup %2174  ;;  %v1935_v62 = vmul.f32 0.6931472, %v2173_v17  ;;  %v1846_v16 = vld [vmem:[#allocation3] sm:$0xff] }
 0x24b   :  { %v2177_v21 = vpop.eup %2176  ;;  %v1903_v4 = vmul.f32 0.6931472, %v2175_v30  ;;  %2180 = vlog2.f32 %v1846_v16  ;;  %vm1878_vm5 = vcmp.gt.f32.partialorder %v1846_v16, 0.0 }
 0x24c   :  { %v1130_v6 = vmul.f32 %v2177_v21, %v1114_v48  ;;  %v2179_v60 = vpop.eup %2178  ;;  %v1227_v7 = vmul.f32 %v2177_v21, %v1211_v50  ;;  %2182 = vpow2.f32 %v944_v13  ;;  %v3594_v13 = vld [vmem:[#allocation6_spill] sm:$0xff] }
 0x24d   :  { %v1962_v38 = vsub.f32 %v1903_v4, %v1935_v62  ;;  %v1927_v44 = vmul.f32 0.6931472, %v2179_v60  ;;  %v3591_v4 = vsub.f32 %v3151_v0, %v3184_v49  ;;  %v1111_v0 = vld [vmem:[#allocation4 + $0x48] sm:$0xff] }
 0x24e   :  { %v1151_v27 = vpop.xlane.xlu0 %1150 }
 0x24f   :  { %v1174_v23 = vadd.f32 %v1151_v27, %v1126_v54  ;;  %v1978_v46 = vsel %vm1882_vm4, %v1962_v38, 0.0  ;;  %v1159_v22 = vpop.xlane.xlu2 %1158  ;;  %v946_v48 = vmul.f32 1.442695, %v3591_v4  ;;  %v3592_v27 = vld [vmem:[#allocation10_spill] sm:$0xff] }
 0x250   :  { %1995 = vst.msk [vmem:[%s3542_s7 + $0x20] sm:$0xff] %vm31_vm15, %v1978_v46  ;;  %v1178_v11 = vadd.f32 %v1159_v22, %v1130_v6  ;;  %v1272_v25 = vpop.xlane.xlu1 %1271 }
 0x251   :  { %v2181_v19 = vpop.eup %2180  ;;  %1191 = vst.msk [vmem:[#allocation4 + $0x40] sm:$0xff] %vm31_vm15, %v1174_v23  ;;  %v1291_v1 = vadd.f32 %v1272_v25, %v1227_v7  ;;  %v3593_v23 = vsub.f32 %v3209_v14, %v3592_v27  ;;  %v1200_v25 = vld [vmem:[#allocation3 + $0x8] sm:$0xff]  ;;  %v1201_v27 = vld [vmem:[#allocation3 + $0x10] sm:$0xff] }
 0x252   :  { %v1895_v57 = vmul.f32 0.6931472, %v2181_v19  ;;  %1195 = vst.msk [vmem:[#allocation4 + $0x60] sm:$0xff] %vm31_vm15, %v1178_v11  ;;  %v2183_v8 = vpop.eup %2182  ;;  %v1208_v19 = vld [vmem:[#allocation3 + $0x48] sm:$0xff] }
 0x253   :  { %1307 = vst.msk [vmem:[#allocation3 + $0x60] sm:$0xff] %vm31_vm15, %v1291_v1  ;;  %v1119_v15 = vmul.f32 %v2183_v8, %v1103_v10  ;;  %v954_v6 = vmul.f32 1.442695, %v3593_v23  ;;  %v1216_v14 = vmul.f32 %v2183_v8, %v1200_v25  ;;  %v3595_v1 = vld [vmem:[#allocation7_spill] sm:$0xff] }
 0x254   :  { %v1958_v28 = vsub.f32 %v1895_v57, %v1927_v44  ;;  %v3596_v44 = vsub.f32 %v3594_v13, %v3595_v1 }
 0x256   :  { %v1974_v35 = vsel %vm1878_vm5, %v1958_v28, 0.0  ;;  %v962_v57 = vmul.f32 1.442695, %v3596_v44 }
 0x257   :  { %1991 = vst.msk [vmem:[%s3542_s7] sm:$0xff] %vm31_vm15, %v1974_v35  ;;  %v1264_v53 = vpop.xlane.xlu2 %1263 }
 0x258   :  { %v1287_v37 = vadd.f32 %v1264_v53, %v1223_v5  ;;  %v1870_v33 = vld [vmem:[#allocation4 + $0x40] sm:$0xff] }
 0x259   :  { %v1874_v2 = vld [vmem:[#allocation4 + $0x60] sm:$0xff] }
 0x25a   :  { %2184 = vlog2.f32 %v1874_v2  ;;  %v1858_v9 = vld [vmem:[#allocation3 + $0x60] sm:$0xff]  ;;  %1303 = vst.msk [vmem:[#allocation3 + $0x40] sm:$0xff] %vm31_vm15, %v1287_v37  ;;  %v3598_v37 = vld [vmem:[#allocation12_spill] sm:$0xff] }
 0x25b   :  { %2186 = vlog2.f32 %v1858_v9  ;;  %vm1890_vm0 = vcmp.gt.f32.partialorder %v1858_v9, 0.0 }
 0x25c   :  { %2188 = vpow2.f32 %v968_v56  ;;  %v3597_v56 = vld [vmem:[#allocation8_spill] sm:$0xff] }
 0x25d   :  { %2190 = vpow2.f32 %v952_v40  ;;  %v3599_v34 = vsub.f32 %v3597_v56, %v3598_v37 }
 0x25e   :  { %2192 = vlog2.f32 %v1870_v33 }
 0x25f   :  { %v1137_v31 = vpop.xlane.xlu1 %1136  ;;  %v970_v40 = vmul.f32 1.442695, %v3599_v34 }
 0x260   :  { %v2185_v42 = vpop.eup %2184  ;;  %v1167_v61 = vadd.f32 %v1137_v31, %v1119_v15  ;;  %v1104_v15 = vld [vmem:[#allocation4 + $0x10] sm:$0xff] }
 0x261   :  { %v2187_v12 = vpop.eup %2186  ;;  %v1951_v39 = vmul.f32 0.6931472, %v2185_v42  ;;  %v1854_v59 = vld [vmem:[#allocation3 + $0x40] sm:$0xff]  ;;  %v1205_v31 = vld [vmem:[#allocation3 + $0x30] sm:$0xff] }
 0x262   :  { %v3419_v51 = vpop.eup %2188  ;;  %v1919_v45 = vmul.f32 0.6931472, %v2187_v12  ;;  %2194 = vlog2.f32 %v1854_v59  ;;  %1184 = vst.msk [vmem:[#allocation4 + $0x8] sm:$0xff] %vm31_vm15, %v1167_v61  ;;  %vm1886_vm6 = vcmp.gt.f32.partialorder %v1854_v59, 0.0  ;;  %v1108_v42 = vld [vmem:[#allocation4 + $0x30] sm:$0xff] }
 0x263   :  { %v2191_v63 = vpop.eup %2190  ;;  %2196 = vpow2.f32 %v960_v41  ;;  %v1131_v52 = vmul.f32 %v3419_v51, %v1115_v3 }
 0x264   :  { %v1970_v26 = vsub.f32 %v1919_v45, %v1951_v39  ;;  %v2193_v17 = vpop.eup %2192  ;;  %v1123_v30 = vmul.f32 %v2191_v63, %v1107_v36  ;;  %v1220_v16 = vmul.f32 %v2191_v63, %v1204_v43  ;;  %2198 = vpow2.f32 %v946_v48 }
 0x265   :  { %v1943_v60 = vmul.f32 0.6931472, %v2193_v17  ;;  %2200 = vpow2.f32 %v954_v6  ;;  %v3600_v43 = vsub.f32 %v3287_v29, %v3310_v58  ;;  %v1116_v29 = vld [vmem:[#allocation4 + $0x70] sm:$0xff] }
 0x266   :  { %v1986_v47 = vsel %vm1890_vm0, %v1970_v26, 0.0  ;;  %v1112_v58 = vld [vmem:[#allocation4 + $0x50] sm:$0xff] }
 0x267   :  { %2003 = vst.msk [vmem:[%s3542_s7 + $0x60] sm:$0xff] %vm31_vm15, %v1986_v47  ;;  %v1145_v20 = vpop.xlane.xlu0 %1144  ;;  %v1161_v62 = vpop.xlane.xlu1 %1160  ;;  %v956_v17 = vmul.f32 1.442695, %v3600_v43  ;;  %v3608_v43 = vld [vmem:[#allocation16_spill] sm:$0xff] }
 0x268   :  { %v2195_v21 = vpop.eup %2194  ;;  %v1171_v54 = vadd.f32 %v1145_v20, %v1123_v30  ;;  %v1179_v50 = vadd.f32 %v1161_v62, %v1131_v52  ;;  %v1258_v38 = vpop.xlane.xlu2 %1257  ;;  %v3601_v62 = vld [vmem:[#allocation9_spill] sm:$0xff] }
 0x269   :  { %v1911_v46 = vmul.f32 0.6931472, %v2195_v21  ;;  %v1284_v22 = vadd.f32 %v1258_v38, %v1220_v16  ;;  %v2197_v7 = vpop.eup %2196  ;;  %v1863_v61 = vld [vmem:[#allocation4 + $0x8] sm:$0xff]  ;;  %v3602_v16 = vld [vmem:[#allocation13_spill] sm:$0xff] }
 0x26a   :  { %1188 = vst.msk [vmem:[#allocation4 + $0x28] sm:$0xff] %vm31_vm15, %v1171_v54  ;;  %v1224_v24 = vmul.f32 %v2197_v7, %v1208_v19  ;;  %v1127_v35 = vmul.f32 %v2197_v7, %v1111_v0  ;;  %v2199_v10 = vpop.eup %2198  ;;  %v3603_v21 = vsub.f32 %v3601_v62, %v3602_v16  ;;  %v1206_v16 = vld [vmem:[#allocation3 + $0x38] sm:$0xff] }
 0x26b   :  { %v1966_v11 = vsub.f32 %v1911_v46, %v1943_v60  ;;  %1196 = vst.msk [vmem:[#allocation4 + $0x68] sm:$0xff] %vm31_vm15, %v1179_v50  ;;  %v2201_v8 = vpop.eup %2200  ;;  %v1120_v12 = vmul.f32 %v2199_v10, %v1104_v15  ;;  %v1217_v25 = vmul.f32 %v2199_v10, %v1201_v27 }
 0x26c   :  { %1300 = vst.msk [vmem:[#allocation3 + $0x28] sm:$0xff] %vm31_vm15, %v1284_v22  ;;  %v1221_v32 = vmul.f32 %v2201_v8, %v1205_v31  ;;  %v1124_v59 = vmul.f32 %v2201_v8, %v1108_v42  ;;  %v948_v4 = vmul.f32 1.442695, %v3603_v21  ;;  %v1105_v8 = vld [vmem:[#allocation4 + $0x18] sm:$0xff] }
 0x26d   :  { %v1982_v49 = vsel %vm1886_vm6, %v1966_v11, 0.0  ;;  %v1202_v21 = vld [vmem:[#allocation3 + $0x18] sm:$0xff] }
 0x26e   :  { %1999 = vst.msk [vmem:[%s3542_s7 + $0x40] sm:$0xff] %vm31_vm15, %v1982_v49 }
 0x26f   :  { %v1250_v18 = vpop.xlane.xlu0 %1249  ;;  %v1266_v28 = vpop.xlane.xlu1 %1265 }
 0x270   :  { %v1280_v5 = vadd.f32 %v1250_v18, %v1216_v14  ;;  %v1288_v53 = vadd.f32 %v1266_v28, %v1224_v24  ;;  %v1153_v55 = vpop.xlane.xlu2 %1152  ;;  %v3604_v18 = vld [vmem:[#allocation11_spill] sm:$0xff] }
 0x271   :  { %v1867_v2 = vld [vmem:[#allocation4 + $0x28] sm:$0xff]  ;;  %v1175_v9 = vadd.f32 %v1153_v55, %v1127_v35 }
 0x272   :  { %2202 = vlog2.f32 %v1867_v2  ;;  %1296 = vst.msk [vmem:[#allocation3 + $0x8] sm:$0xff] %vm31_vm15, %v1280_v5  ;;  %v3605_v28 = vld [vmem:[#allocation15_spill] sm:$0xff]  ;;  %v1209_v2 = vld [vmem:[#allocation3 + $0x50] sm:$0xff] }
 0x273   :  { %2204 = vpow2.f32 %v962_v57  ;;  %v1851_v33 = vld [vmem:[#allocation3 + $0x28] sm:$0xff]  ;;  %1304 = vst.msk [vmem:[#allocation3 + $0x48] sm:$0xff] %vm31_vm15, %v1288_v53  ;;  %v3606_v35 = vsub.f32 %v3604_v18, %v3605_v28 }
 0x274   :  { %2206 = vlog2.f32 %v1851_v33  ;;  %1192 = vst.msk [vmem:[#allocation4 + $0x48] sm:$0xff] %vm31_vm15, %v1175_v9  ;;  %vm1883_vm12 = vcmp.gt.f32.partialorder %v1851_v33, 0.0  ;;  %v1109_v9 = vld [vmem:[#allocation4 + $0x38] sm:$0xff] }
 0x275   :  { %2208 = vpow2.f32 %v970_v40  ;;  %v972_v5 = vmul.f32 1.442695, %v3606_v35 }
 0x276   :  { %2210 = vlog2.f32 %v1863_v61 }
 0x277   :  { %v1139_v41 = vpop.xlane.xlu0 %1138  ;;  %v1260_v39 = vpop.xlane.xlu1 %1259 }
 0x278   :  { %v2203_v45 = vpop.eup %2202  ;;  %v1168_v63 = vadd.f32 %v1139_v41, %v1120_v12  ;;  %v1285_v36 = vadd.f32 %v1260_v39, %v1221_v32  ;;  %v1147_v3 = vpop.xlane.xlu2 %1146 }
 0x279   :  { %v3449_v26 = vpop.eup %2204  ;;  %v1937_v47 = vmul.f32 0.6931472, %v2203_v45  ;;  %v1847_v30 = vld [vmem:[#allocation3 + $0x8] sm:$0xff]  ;;  %v1172_v52 = vadd.f32 %v1147_v3, %v1124_v59  ;;  %v3607_v3 = vld [vmem:[#allocation14_spill] sm:$0xff] }
 0x27a   :  { %v2207_v20 = vpop.eup %2206  ;;  %2212 = vlog2.f32 %v1847_v30  ;;  %v1855_v48 = vld [vmem:[#allocation3 + $0x48] sm:$0xff]  ;;  %1185 = vst.msk [vmem:[#allocation4 + $0x10] sm:$0xff] %vm31_vm15, %v1168_v63  ;;  %v1128_v46 = vmul.f32 %v3449_v26, %v1112_v58  ;;  %vm1879_vm7 = vcmp.gt.f32.partialorder %v1847_v30, 0.0  ;;  %v1225_v31 = vmul.f32 %v3449_v26, %v1209_v2 }
 0x27b   :  { %v3458_v54 = vpop.eup %2208  ;;  %v1905_v50 = vmul.f32 0.6931472, %v2207_v20  ;;  %2214 = vlog2.f32 %v1855_v48  ;;  %v1871_v38 = vld [vmem:[#allocation4 + $0x48] sm:$0xff]  ;;  %1301 = vst.msk [vmem:[#allocation3 + $0x30] sm:$0xff] %vm31_vm15, %v1285_v36  ;;  %vm1887_vm8 = vcmp.gt.f32.partialorder %v1855_v48, 0.0  ;;  %v1117_v48 = vld [vmem:[#allocation4 + $0x78] sm:$0xff] }
 0x27c   :  { %2216 = vlog2.f32 %v1871_v38  ;;  %1189 = vst.msk [vmem:[#allocation4 + $0x30] sm:$0xff] %vm31_vm15, %v1172_v52  ;;  %v2211_v6 = vpop.eup %2210  ;;  %v1132_v60 = vmul.f32 %v3458_v54, %v1116_v29 }
 0x27d   :  { %2218 = vpow2.f32 %v956_v17  ;;  %v1963_v23 = vsub.f32 %v1905_v50, %v1937_v47  ;;  %v1929_v13 = vmul.f32 0.6931472, %v2211_v6  ;;  %v3609_v17 = vsub.f32 %v3607_v3, %v3608_v43 }
 0x27e   :  { %2220 = vpow2.f32 %v948_v4 }
 0x27f   :  { %v1979_v22 = vsel %vm1883_vm12, %v1963_v23, 0.0  ;;  %v1163_v7 = vpop.xlane.xlu0 %1162  ;;  %v1155_v11 = vpop.xlane.xlu1 %1154  ;;  %v964_v47 = vmul.f32 1.442695, %v3609_v17 }
 0x280   :  { %v2213_v19 = vpop.eup %2212  ;;  %1996 = vst.msk [vmem:[%s3542_s7 + $0x28] sm:$0xff] %vm31_vm15, %v1979_v22  ;;  %v1180_v0 = vadd.f32 %v1163_v7, %v1132_v60  ;;  %v1176_v49 = vadd.f32 %v1155_v11, %v1128_v46  ;;  %v1252_v14 = vpop.xlane.xlu2 %1251 }
 0x281   :  { %v2215_v24 = vpop.eup %2214  ;;  %v1897_v1 = vmul.f32 0.6931472, %v2213_v19  ;;  %v1281_v44 = vadd.f32 %v1252_v14, %v1217_v25  ;;  %v1864_v12 = vld [vmem:[#allocation4 + $0x10] sm:$0xff] }
 0x282   :  { %v2217_v57 = vpop.eup %2216  ;;  %v1913_v53 = vmul.f32 0.6931472, %v2215_v24  ;;  %v1852_v55 = vld [vmem:[#allocation3 + $0x30] sm:$0xff]  ;;  %1197 = vst.msk [vmem:[#allocation4 + $0x70] sm:$0xff] %vm31_vm15, %v1180_v0 }
 0x283   :  { %v2219_v56 = vpop.eup %2218  ;;  %v1959_v37 = vsub.f32 %v1897_v1, %v1929_v13  ;;  %v1945_v34 = vmul.f32 0.6931472, %v2217_v57  ;;  %2222 = vlog2.f32 %v1852_v55  ;;  %v1868_v40 = vld [vmem:[#allocation4 + $0x30] sm:$0xff]  ;;  %1193 = vst.msk [vmem:[#allocation4 + $0x50] sm:$0xff] %vm31_vm15, %v1176_v49  ;;  %vm1884_vm9 = vcmp.gt.f32.partialorder %v1852_v55, 0.0  ;;  %v1113_v49 = vld [vmem:[#allocation4 + $0x58] sm:$0xff] }
 0x284   :  { %v2221_v10 = vpop.eup %2220  ;;  %2224 = vlog2.f32 %v1868_v40  ;;  %1297 = vst.msk [vmem:[#allocation3 + $0x10] sm:$0xff] %vm31_vm15, %v1281_v44  ;;  %v1125_v42 = vmul.f32 %v2219_v56, %v1109_v9  ;;  %v1222_v29 = vmul.f32 %v2219_v56, %v1206_v16  ;;  %v1214_v1 = vld [vmem:[#allocation3 + $0x78] sm:$0xff] }
 0x285   :  { %v1975_v33 = vsel %vm1879_vm7, %v1959_v37, 0.0  ;;  %v1967_v15 = vsub.f32 %v1913_v53, %v1945_v34  ;;  %2226 = vpow2.f32 %v972_v5  ;;  %v1121_v39 = vmul.f32 %v2221_v10, %v1105_v8  ;;  %v1210_v44 = vld [vmem:[#allocation3 + $0x58] sm:$0xff] }
 0x286   :  { %1992 = vst.msk [vmem:[%s3542_s7 + $0x8] sm:$0xff] %vm31_vm15, %v1975_v33  ;;  %2228 = vlog2.f32 %v1864_v12  ;;  %v1218_v58 = vmul.f32 %v2221_v10, %v1202_v21  ;;  %v1212_v12 = vld [vmem:[#allocation3 + $0x68] sm:$0xff] }
 0x287   :  { %v1983_v61 = vsel %vm1887_vm8, %v1967_v15, 0.0  ;;  %v1268_v32 = vpop.xlane.xlu0 %1267  ;;  %v1149_v41 = vpop.xlane.xlu1 %1148 }
 0x288   :  { %2000 = vst.msk [vmem:[%s3542_s7 + $0x48] sm:$0xff] %vm31_vm15, %v1983_v61  ;;  %v1289_v59 = vadd.f32 %v1268_v32, %v1225_v31  ;;  %v1173_v45 = vadd.f32 %v1149_v41, %v1125_v42  ;;  %v1141_v63 = vpop.xlane.xlu2 %1140  ;;  %v1213_v32 = vld [vmem:[#allocation3 + $0x70] sm:$0xff] }
 0x289   :  { %v2223_v36 = vpop.eup %2222  ;;  %v1169_v26 = vadd.f32 %v1141_v63, %v1121_v39  ;;  %v1229_v3 = vmul.f32 %v3458_v54, %v1213_v32 }
 0x28a   :  { %v2225_v30 = vpop.eup %2224  ;;  %v1907_v52 = vmul.f32 0.6931472, %v2223_v36  ;;  %1305 = vst.msk [vmem:[#allocation3 + $0x50] sm:$0xff] %vm31_vm15, %v1289_v59  ;;  %v1872_v38 = vld [vmem:[#allocation4 + $0x50] sm:$0xff] }
 0x28b   :  { %v1939_v20 = vmul.f32 0.6931472, %v2225_v30  ;;  %v1848_v62 = vld [vmem:[#allocation3 + $0x10] sm:$0xff]  ;;  %1190 = vst.msk [vmem:[#allocation4 + $0x38] sm:$0xff] %vm31_vm15, %v1173_v45  ;;  %v2227_v4 = vpop.eup %2226  ;;  %v1228_v45 = vmul.f32 %v3419_v51, %v1212_v12 }
 0x28c   :  { %2230 = vlog2.f32 %v1848_v62  ;;  %1186 = vst.msk [vmem:[#allocation4 + $0x18] sm:$0xff] %vm31_vm15, %v1169_v26  ;;  %v1133_v60 = vmul.f32 %v2227_v4, %v1117_v48  ;;  %v2229_v46 = vpop.eup %2228  ;;  %vm1880_vm10 = vcmp.gt.f32.partialorder %v1848_v62, 0.0  ;;  %v1230_v53 = vmul.f32 %v2227_v4, %v1214_v1 }
 0x28d   :  { %2232 = vpow2.f32 %v964_v47  ;;  %v1964_v50 = vsub.f32 %v1907_v52, %v1939_v20  ;;  %v1931_v24 = vmul.f32 0.6931472, %v2229_v46 }
 0x28e   :  { %2234 = vlog2.f32 %v1872_v38 }
 0x28f   :  { %v1980_v27 = vsel %vm1884_vm9, %v1964_v50, 0.0  ;;  %v1262_v23 = vpop.xlane.xlu0 %1261  ;;  %v1254_v6 = vpop.xlane.xlu1 %1253  ;;  %v1875_v50 = vld [vmem:[#allocation4 + $0x68] sm:$0xff] }
 0x290   :  { %1997 = vst.msk [vmem:[%s3542_s7 + $0x30] sm:$0xff] %vm31_vm15, %v1980_v27  ;;  %v1286_v22 = vadd.f32 %v1262_v23, %v1222_v29  ;;  %v1282_v7 = vadd.f32 %v1254_v6, %v1218_v58  ;;  %v1165_v11 = vpop.xlane.xlu2 %1164  ;;  %v1876_v29 = vld [vmem:[#allocation4 + $0x70] sm:$0xff] }
 0x291   :  { %v1856_v25 = vld [vmem:[#allocation3 + $0x50] sm:$0xff]  ;;  %v1181_v19 = vadd.f32 %v1165_v11, %v1133_v60 }
 0x292   :  { %v2231_v0 = vpop.eup %2230  ;;  %2236 = vlog2.f32 %v1856_v25  ;;  %1302 = vst.msk [vmem:[#allocation3 + $0x38] sm:$0xff] %vm31_vm15, %v1286_v22  ;;  %v1869_v18 = vld [vmem:[#allocation4 + $0x38] sm:$0xff]  ;;  %vm1888_vm11 = vcmp.gt.f32.partialorder %v1856_v25, 0.0 }
 0x293   :  { %v2233_v14 = vpop.eup %2232  ;;  %v1899_v13 = vmul.f32 0.6931472, %v2231_v0  ;;  %1298 = vst.msk [vmem:[#allocation3 + $0x18] sm:$0xff] %vm31_vm15, %v1282_v7  ;;  %v1865_v35 = vld [vmem:[#allocation4 + $0x18] sm:$0xff]  ;;  %2238 = vlog2.f32 %v1869_v18 }
 0x294   :  { %1198 = vst.msk [vmem:[#allocation4 + $0x78] sm:$0xff] %vm31_vm15, %v1181_v19  ;;  %v2235_v28 = vpop.eup %2234  ;;  %v1129_v5 = vmul.f32 %v2233_v14, %v1113_v49  ;;  %v1226_v34 = vmul.f32 %v2233_v14, %v1210_v44  ;;  %2240 = vlog2.f32 %v1865_v35 }
 0x295   :  { %v1960_v57 = vsub.f32 %v1899_v13, %v1931_v24  ;;  %v1947_v8 = vmul.f32 0.6931472, %v2235_v28 }
 0x297   :  { %v1976_v55 = vsel %vm1880_vm10, %v1960_v57, 0.0  ;;  %v1157_v56 = vpop.xlane.xlu0 %1156  ;;  %v1278_v37 = vpop.xlane.xlu1 %1277 }
 0x298   :  { %v2237_v40 = vpop.eup %2236  ;;  %1993 = vst.msk [vmem:[%s3542_s7 + $0x10] sm:$0xff] %vm31_vm15, %v1976_v55  ;;  %v1177_v2 = vadd.f32 %v1157_v56, %v1129_v5  ;;  %v1294_v9 = vadd.f32 %v1278_v37, %v1230_v53  ;;  %v1270_v10 = vpop.xlane.xlu2 %1269 }
 0x299   :  { %v1915_v33 = vmul.f32 0.6931472, %v2237_v40  ;;  %v1853_v15 = vld [vmem:[#allocation3 + $0x38] sm:$0xff]  ;;  %v1290_v31 = vadd.f32 %v1270_v10, %v1226_v34  ;;  %v2239_v39 = vpop.eup %2238 }
 0x29a   :  { %2242 = vlog2.f32 %v1853_v15  ;;  %v1849_v42 = vld [vmem:[#allocation3 + $0x18] sm:$0xff]  ;;  %1194 = vst.msk [vmem:[#allocation4 + $0x58] sm:$0xff] %vm31_vm15, %v1177_v2  ;;  %v2241_v63 = vpop.eup %2240  ;;  %v1941_v30 = vmul.f32 0.6931472, %v2239_v39  ;;  %vm1885_vm13 = vcmp.gt.f32.partialorder %v1853_v15, 0.0 }
 0x29b   :  { %v1968_v61 = vsub.f32 %v1915_v33, %v1947_v8  ;;  %2244 = vlog2.f32 %v1849_v42  ;;  %1310 = vst.msk [vmem:[#allocation3 + $0x78] sm:$0xff] %vm31_vm15, %v1294_v9  ;;  %v1877_v59 = vld [vmem:[#allocation4 + $0x78] sm:$0xff]  ;;  %v1933_v16 = vmul.f32 0.6931472, %v2241_v63  ;;  %vm1881_vm14 = vcmp.gt.f32.partialorder %v1849_v42, 0.0 }
 0x29c   :  { %1306 = vst.msk [vmem:[#allocation3 + $0x58] sm:$0xff] %vm31_vm15, %v1290_v31  ;;  %2246 = vlog2.f32 %v1877_v59 }
 0x29d   :  { %v1984_v41 = vsel %vm1888_vm11, %v1968_v61, 0.0 }
 0x29e   :  { %2001 = vst.msk [vmem:[%s3542_s7 + $0x50] sm:$0xff] %vm31_vm15, %v1984_v41 }
 0x29f   :  { %v1274_v36 = vpop.xlane.xlu0 %1273 }
 0x2a0   :  { %v2243_v43 = vpop.eup %2242  ;;  %v1292_v17 = vadd.f32 %v1274_v36, %v1228_v45  ;;  %v1276_v47 = vpop.xlane.xlu2 %1275 }
 0x2a1   :  { %v2245_v26 = vpop.eup %2244  ;;  %v1909_v52 = vmul.f32 0.6931472, %v2243_v43  ;;  %v1873_v20 = vld [vmem:[#allocation4 + $0x58] sm:$0xff]  ;;  %v1293_v62 = vadd.f32 %v1276_v47, %v1229_v3 }
 0x2a2   :  { %v1901_v21 = vmul.f32 0.6931472, %v2245_v26  ;;  %2248 = vlog2.f32 %v1873_v20  ;;  %v1861_v4 = vld [vmem:[#allocation3 + $0x78] sm:$0xff]  ;;  %1308 = vst.msk [vmem:[#allocation3 + $0x68] sm:$0xff] %vm31_vm15, %v1292_v17  ;;  %v2247_v27 = vpop.eup %2246 }
 0x2a3   :  { %v1965_v51 = vsub.f32 %v1909_v52, %v1941_v30  ;;  %2250 = vlog2.f32 %v1861_v4  ;;  %v1857_v48 = vld [vmem:[#allocation3 + $0x58] sm:$0xff]  ;;  %1309 = vst.msk [vmem:[#allocation3 + $0x70] sm:$0xff] %vm31_vm15, %v1293_v62  ;;  %v1957_v7 = vmul.f32 0.6931472, %v2247_v27  ;;  %vm1893_vm2 = vcmp.gt.f32.partialorder %v1861_v4, 0.0 }
 0x2a4   :  { %v1961_v54 = vsub.f32 %v1901_v21, %v1933_v16  ;;  %2252 = vlog2.f32 %v1857_v48  ;;  %vm1889_vm1 = vcmp.gt.f32.partialorder %v1857_v48, 0.0 }
 0x2a5   :  { %v1981_v38 = vsel %vm1885_vm13, %v1965_v51, 0.0  ;;  %2254 = vlog2.f32 %v1875_v50 }
 0x2a6   :  { %1998 = vst.msk [vmem:[%s3542_s7 + $0x38] sm:$0xff] %vm31_vm15, %v1981_v38  ;;  %v1977_v58 = vsel %vm1881_vm14, %v1961_v54, 0.0  ;;  %2256 = vlog2.f32 %v1876_v29 }
 0x2a7   :  { %1994 = vst.msk [vmem:[%s3542_s7 + $0x18] sm:$0xff] %vm31_vm15, %v1977_v58 }
 0x2a8   :  { %v2249_v23 = vpop.eup %2248 }
 0x2a9   :  { %v2251_v6 = vpop.eup %2250  ;;  %v1949_v60 = vmul.f32 0.6931472, %v2249_v23  ;;  %v1859_v46 = vld [vmem:[#allocation3 + $0x68] sm:$0xff] }
 0x2aa   :  { %v2253_v22 = vpop.eup %2252  ;;  %v1925_v11 = vmul.f32 0.6931472, %v2251_v6  ;;  %2258 = vlog2.f32 %v1859_v46  ;;  %v1860_v25 = vld [vmem:[#allocation3 + $0x70] sm:$0xff]  ;;  %vm1891_vm3 = vcmp.gt.f32.partialorder %v1859_v46, 0.0 }
 0x2ab   :  { %v1917_v19 = vmul.f32 0.6931472, %v2253_v22  ;;  %2260 = vlog2.f32 %v1860_v25  ;;  %v2255_v14 = vpop.eup %2254  ;;  %vm1892_vm4 = vcmp.gt.f32.partialorder %v1860_v25, 0.0 }
 0x2ac   :  { %v1973_v0 = vsub.f32 %v1925_v11, %v1957_v7  ;;  %v2257_v13 = vpop.eup %2256  ;;  %v1953_v18 = vmul.f32 0.6931472, %v2255_v14 }
 0x2ad   :  { %v1969_v49 = vsub.f32 %v1917_v19, %v1949_v60  ;;  %v1955_v35 = vmul.f32 0.6931472, %v2257_v13 }
 0x2ae   :  { %v1989_v24 = vsel %vm1893_vm2, %v1973_v0, 0.0 }
 0x2af   :  { %2006 = vst.msk [vmem:[%s3542_s7 + $0x78] sm:$0xff] %vm31_vm15, %v1989_v24  ;;  %v1985_v1 = vsel %vm1889_vm1, %v1969_v49, 0.0 }
 0x2b0   :  { %v2259_v44 = vpop.eup %2258  ;;  %2002 = vst.msk [vmem:[%s3542_s7 + $0x58] sm:$0xff] %vm31_vm15, %v1985_v1 }
 0x2b1   :  { %v2261_v57 = vpop.eup %2260  ;;  %v1921_v28 = vmul.f32 0.6931472, %v2259_v44 }
 0x2b2   :  { %v1923_v5 = vmul.f32 0.6931472, %v2261_v57 }
 0x2b3   :  { %v1971_v53 = vsub.f32 %v1921_v28, %v1953_v18 }
 0x2b4   :  { %v1972_v55 = vsub.f32 %v1923_v5, %v1955_v35 }
 0x2b5   :  { %v1987_v56 = vsel %vm1891_vm3, %v1971_v53, 0.0 }
 0x2b6   :  { %2004 = vst.msk [vmem:[%s3542_s7 + $0x68] sm:$0xff] %vm31_vm15, %v1987_v56  ;;  %v1988_v37 = vsel %vm1892_vm4, %v1972_v55, 0.0 }
 0x2b7   :  { %2005 = vst.msk [vmem:[%s3542_s7 + $0x70] sm:$0xff] %vm31_vm15, %v1988_v37 }

</bundles_post_ra>
